<compile_context>
chip_gen: v7x
topology: tpu7x:2x2x1
jax: 0.10.0
libtpu: 0.0.40
codegen_flags: <defaults>
</compile_context>

<pallas_src>
import functools

import jax
import jax.numpy as jnp
import numpy as np
from jax import lax
from jax.experimental import pallas as pl
from jax.experimental.pallas import tpu as pltpu


def _round_up(x, m):
    return ((x + m - 1) // m) * m


def _footprint_bytes(bt, H, W, Cp, Crp, L):
    """Rough per-step VMEM working-set estimate (bytes)."""
    m = bt * H * W
    b = 0
    b += 2 * 2 * m * Cp * 4                      # x / out blocks, double-buffered (f32)
    b += m * Cp * 4                              # resident activation scratch (f32)
    b += 2 * L * (9 * Cp * Crp + Crp * Cp) * 2   # resident bf16 weights (2 buffers)
    b += 4 * m * Cp * 2                          # relu'd h + two W-shifted copies (bf16)
    b += 2 * m * 3 * Cp * 2                      # S + one row-shifted copy (bf16)
    b += 2 * m * Crp * 4                         # conv accumulator + headroom (f32)
    b += m * Cp * 4                              # residual temp (f32)
    return b


def _choose_batch_tile(N, H, W, Cp, Crp, L, budget_bytes=24 << 20):
    """Largest divisor of N whose working set fits the VMEM budget; keeps at
    least 2 steps on the parallel axis (v7x megacore) when N >= 2."""
    best = 1
    for bt in range(1, N + 1):
        if N % bt:
            continue
        if N // bt < min(2, N):
            continue
        if _footprint_bytes(bt, H, W, Cp, Crp, L) <= budget_bytes:
            best = bt
    return best


def _stack_kernel(x_ref, w3_ref, w1_ref, o_ref, act_ref, *, H, W, C, Cr,
                  n_layers, bt):
    """Fused residual stack.  grid = (batch-tile, layer); layer axis 'arbitrary'.

    x_ref  : (Bt, H, W, C)        f32   channel-padded input tile
    w3_ref : (L, 3, 3*C, Cr)      bf16  per-layer 3x3 weights, rows = (kx, ci)
    w1_ref : (L, Cr, C)           bf16  per-layer 1x1 weights
    o_ref  : (Bt, H, W, C)        f32   output (written on the last layer only)
    act_ref: (Bt, H, W, C)        f32   VMEM-resident activation across layers
    """
    l = pl.program_id(1)

    @pl.when(l == 0)
    def _():
        act_ref[...] = x_ref[...]

    act = act_ref[...]                                        # (Bt,H,W,C) f32
    h = jnp.maximum(act, 0.0).astype(jnp.bfloat16)            # ReLU -> bf16

    # --- width (sublane-axis) shifts with zero fill --------------------------
    zero_col = jnp.zeros((bt, H, 1, C), jnp.bfloat16)
    h_xm1 = jnp.concatenate([zero_col, h[:, :, :W - 1, :]], axis=2)  # h[.., x-1]
    h_xp1 = jnp.concatenate([h[:, :, 1:, :], zero_col], axis=2)      # h[.., x+1]

    # One lane-aligned shifted-column buffer; lane block kx holds h[y, x+kx-1].
    S = jnp.concatenate([h_xm1, h, h_xp1], axis=-1)           # (Bt,H,W,3C) bf16

    # --- 3x3 conv = 3 accumulating matmuls over row shifts dy ---------------
    zero_row = jnp.zeros((bt, 1, W, 3 * C), jnp.bfloat16)
    M = bt * H * W

    acc = None
    for ky, dy in enumerate((-1, 0, 1)):
        if dy == 0:
            s_dy = S
        elif dy > 0:                                          # S[:, y+1]
            s_dy = jnp.concatenate([S[:, 1:], zero_row], axis=1)
        else:                                                 # S[:, y-1]
            s_dy = jnp.concatenate([zero_row, S[:, :H - 1]], axis=1)
        w_k = w3_ref[l, ky]                                   # (3C, Cr) bf16
        d = jnp.dot(s_dy.reshape(M, 3 * C), w_k,
                    preferred_element_type=jnp.float32)
        acc = d if acc is None else acc + d                   # f32 accumulate

    hid = jnp.maximum(acc, 0.0).astype(jnp.bfloat16)          # ReLU  (M, Cr)
    blk = jnp.dot(hid, w1_ref[l],
                  preferred_element_type=jnp.float32)         # 1x1 conv (M, C)

    new_act = act + blk.reshape(bt, H, W, C)                  # residual (f32)
    act_ref[...] = new_act

    @pl.when(l == n_layers - 1)
    def _():
        # final F.relu after the last residual layer
        o_ref[...] = jnp.maximum(new_act, 0.0).astype(o_ref.dtype)


def prepare_residual_params(params):
    """One-time host-side packing (hoisted out of the forward call).

    params: [(w3 HWIO (3,3,Cin,Cres), w1 (Cres,Chid)), ...]
    Returns (w3_all (L,3,3*Cp,Crp) bf16, w1_all (L,Crp,Cp) bf16).
    """
    w3_0, w1_0 = params[0]
    _, _, Cin, Cres = w3_0.shape
    Chid = w1_0.shape[1]
    assert Cin == Chid, "residual add requires in_channels == num_hiddens"

    Cp = _round_up(Cin, 128)       # lane-dense channel padding
    Crp = _round_up(Cres, 128)

    w3s, w1s = [], []
    for w3, w1 in params:
        w3p = jnp.pad(w3, ((0, 0), (0, 0), (0, Cp - Cin), (0, Crp - Cres)))
        w3s.append(w3p.reshape(3, 3 * Cp, Crp).astype(jnp.bfloat16))
        w1p = jnp.pad(w1, ((0, Crp - Cres), (0, Cp - Chid)))
        w1s.append(w1p.astype(jnp.bfloat16))
    return jnp.stack(w3s), jnp.stack(w1s)


def residual_stack_fused(x, w3_all, w1_all):
    """x: (N, H, W, Cin) NHWC f32; weights from prepare_residual_params."""
    N, H, W, Cin = x.shape
    L, three, K3, Crp = w3_all.shape
    assert three == 3
    Cp = K3 // 3
    assert w1_all.shape == (L, Crp, Cp)
    assert Cin <= Cp

    xp = x if Cp == Cin else jnp.pad(x, ((0, 0), (0, 0), (0, 0), (0, Cp - Cin)))

    Bt = _choose_batch_tile(N, H, W, Cp, Crp, L)
    NB = N // Bt

    kernel = functools.partial(_stack_kernel, H=H, W=W, C=Cp, Cr=Crp,
                               n_layers=L, bt=Bt)

    fp = _footprint_bytes(Bt, H, W, Cp, Crp, L)
    vmem_limit = int(min(max(2 * fp + (8 << 20), 32 << 20), 56 << 20))

    flops = 2 * N * H * W * (9 * Cp * Crp + Crp * Cp) * L
    bytes_accessed = (2 * N * H * W * Cp * 4            # activation in + out
                      + (w3_all.size + w1_all.size) * 2)  # weights fetched once

    out = pl.pallas_call(
        kernel,
        out_shape=jax.ShapeDtypeStruct((N, H, W, Cp), x.dtype),
        grid_spec=pltpu.PrefetchScalarGridSpec(
            num_scalar_prefetch=0,
            grid=(NB, L),                         # batch tiles parallel, layers serial
            in_specs=[
                pl.BlockSpec((Bt, H, W, Cp), lambda n, l: (n, 0, 0, 0)),
                # Weights: constant block index -> fetched once, VMEM-resident.
                pl.BlockSpec((L, 3, 3 * Cp, Crp), lambda n, l: (0, 0, 0, 0)),
                pl.BlockSpec((L, Crp, Cp), lambda n, l: (0, 0, 0)),
            ],
            out_specs=pl.BlockSpec((Bt, H, W, Cp), lambda n, l: (n, 0, 0, 0)),
            scratch_shapes=[pltpu.VMEM((Bt, H, W, Cp), jnp.float32)],
        ),
        compiler_params=pltpu.CompilerParams(
            dimension_semantics=("parallel", "arbitrary"),
            vmem_limit_bytes=vmem_limit),
        cost_estimate=pl.CostEstimate(
            flops=int(flops), transcendentals=0,
            bytes_accessed=int(bytes_accessed)),
    )(xp, w3_all, w1_all)

    return out[..., :Cin]                          # drop zero-padded channels


def residual_stack(x, params):
    """Convenience wrapper: pack weights then run the fused kernel."""
    w3_all, w1_all = prepare_residual_params(params)
    return residual_stack_fused(x, w3_all, w1_all)


def residual_stack_ref(x, params):
    """Pure-JAX NHWC reference matching the PyTorch module semantics."""
    dn = ("NHWC", "HWIO", "NHWC")
    for w3, w1 in params:
        h = jax.nn.relu(x)
        h = lax.conv_general_dilated(h, w3, window_strides=(1, 1),
                                     padding="SAME", dimension_numbers=dn)
        h = jax.nn.relu(h)
        h = lax.conv_general_dilated(h, w1[None, None, :, :],
                                     window_strides=(1, 1),
                                     padding="VALID", dimension_numbers=dn)
        x = x + h
    return jax.nn.relu(x)


if __name__ == "__main__":
    # Small shapes consistent with the module (residual add requires
    # in_channels == num_hiddens).
    N, H, W = 2, 16, 16
    in_channels = num_hiddens = 8
    num_residual_hiddens = 4
    num_residual_layers = 2

    key = jax.random.PRNGKey(0)
    kx, *kws = jax.random.split(key, 1 + 2 * num_residual_layers)

    x = jax.random.normal(kx, (N, H, W, in_channels), dtype=jnp.float32)

    params = []
    for i in range(num_residual_layers):
        w3 = 0.1 * jax.random.normal(
            kws[2 * i], (3, 3, in_channels, num_residual_hiddens), jnp.float32)
        w1 = 0.1 * jax.random.normal(
            kws[2 * i + 1], (num_residual_hiddens, num_hiddens), jnp.float32)
        params.append((w3, w1))

    # Weight packing is hoisted: done once, reused across forward calls.
    w3_all, w1_all = prepare_residual_params(params)
    run = jax.jit(residual_stack_fused)

    out = jax.block_until_ready(run(x, w3_all, w1_all))
    ref = jax.block_until_ready(residual_stack_ref(x, params))

    # bf16 matmul operands with f32 accumulation -> loose-ish tolerance.
    np.testing.assert_allclose(np.asarray(out), np.asarray(ref),
                               rtol=2e-2, atol=2e-2)
    print("KERNEL_OK")
</pallas_src>

<mosaic_0001>
module attributes {stable_mosaic.version = 11 : i64} {
  func.func @_stack_kernel(%arg0: i32, %arg1: i32, %arg2: memref<1x16x16x128xf32, #tpu.memory_space<vmem>>, %arg3: memref<2x3x384x128xbf16, #tpu.memory_space<vmem>>, %arg4: memref<2x128x128xbf16, #tpu.memory_space<vmem>>, %arg5: memref<1x16x16x128xf32, #tpu.memory_space<vmem>>, %arg6: memref<1x16x16x128xf32, #tpu.memory_space<vmem>>) attributes {dimension_semantics = [#tpu.dimension_semantics<parallel>, #tpu.dimension_semantics<arbitrary>], iteration_bounds = array<i64: 2, 2>, scalar_prefetch = 0 : i64, scratch_operands = 1 : i64, tpu.core_type = #tpu.core_type<tc>, window_params = [{transform_indices = @transform_0, window_bounds = array<i64: 1, 16, 16, 128>}, {pipeline_mode = #tpu.pipeline_mode<synchronous>, transform_indices = @transform_1, window_bounds = array<i64: 2, 3, 384, 128>}, {pipeline_mode = #tpu.pipeline_mode<synchronous>, transform_indices = @transform_2, window_bounds = array<i64: 2, 128, 128>}, {transform_indices = @transform_3, window_bounds = array<i64: 1, 16, 16, 128>}]} {
    %c0_i32 = arith.constant 0 : i32
    %0 = arith.cmpi eq, %arg1, %c0_i32 : i32
    %1 = arith.extui %0 : i1 to i32
    %c0_i32_0 = arith.constant 0 : i32
    %2 = arith.cmpi ne, %1, %c0_i32_0 : i32
    scf.if %2 {
      %c0_25 = arith.constant 0 : index
      %c0_26 = arith.constant 0 : index
      %c0_27 = arith.constant 0 : index
      %c0_28 = arith.constant 0 : index
      %48 = vector.load %arg2[%c0_25, %c0_26, %c0_27, %c0_28] : memref<1x16x16x128xf32, #tpu.memory_space<vmem>>, vector<1x16x16x128xf32>
      %c0_29 = arith.constant 0 : index
      %c0_30 = arith.constant 0 : index
      %c0_31 = arith.constant 0 : index
      %c0_32 = arith.constant 0 : index
      %49 = vector.load %arg6[%c0_29, %c0_30, %c0_31, %c0_32] : memref<1x16x16x128xf32, #tpu.memory_space<vmem>>, vector<1x16x16x128xf32>
      tpu.vector_store %arg6[%c0_29, %c0_30, %c0_31, %c0_32], %48 {strides = array<i32>} : memref<1x16x16x128xf32, #tpu.memory_space<vmem>>, vector<1x16x16x128xf32>,
    } else {
    }
    %c0 = arith.constant 0 : index
    %c0_1 = arith.constant 0 : index
    %c0_2 = arith.constant 0 : index
    %c0_3 = arith.constant 0 : index
    %3 = vector.load %arg6[%c0, %c0_1, %c0_2, %c0_3] : memref<1x16x16x128xf32, #tpu.memory_space<vmem>>, vector<1x16x16x128xf32>
    %cst = arith.constant 0.000000e+00 : f32
    %4 = vector.broadcast %cst : f32 to vector<1x16x16x128xf32>
    %5 = arith.maximumf %3, %4 : vector<1x16x16x128xf32>
    %6 = arith.truncf %5 : vector<1x16x16x128xf32> to vector<1x16x16x128xbf16>
    %cst_4 = arith.constant 0.000000e+00 : bf16
    %7 = vector.broadcast %cst_4 : bf16 to vector<1x16x1x128xbf16>
    %8 = vector.extract_strided_slice %6 {offsets = [0, 0, 0, 0], sizes = [1, 16, 15, 128], strides = [1, 1, 1, 1]} : vector<1x16x16x128xbf16> to vector<1x16x15x128xbf16>
    %9 = tpu.concatenate %7, %8 in 2 : vector<1x16x1x128xbf16>, vector<1x16x15x128xbf16> -> vector<1x16x16x128xbf16>
    %10 = vector.extract_strided_slice %6 {offsets = [0, 0, 1, 0], sizes = [1, 16, 15, 128], strides = [1, 1, 1, 1]} : vector<1x16x16x128xbf16> to vector<1x16x15x128xbf16>
    %11 = tpu.concatenate %10, %7 in 2 : vector<1x16x15x128xbf16>, vector<1x16x1x128xbf16> -> vector<1x16x16x128xbf16>
    %12 = tpu.concatenate %9, %6, %11 in 3 : vector<1x16x16x128xbf16>, vector<1x16x16x128xbf16>, vector<1x16x16x128xbf16> -> vector<1x16x16x384xbf16>
    %cst_5 = arith.constant 0.000000e+00 : bf16
    %13 = vector.broadcast %cst_5 : bf16 to vector<1x1x16x384xbf16>
    %14 = vector.extract_strided_slice %12 {offsets = [0, 0, 0, 0], sizes = [1, 15, 16, 384], strides = [1, 1, 1, 1]} : vector<1x16x16x384xbf16> to vector<1x15x16x384xbf16>
    %15 = tpu.concatenate %13, %14 in 1 : vector<1x1x16x384xbf16>, vector<1x15x16x384xbf16> -> vector<1x16x16x384xbf16>
    %16 = arith.index_cast %arg1 : i32 to index
    %c0_6 = arith.constant 0 : index
    %c0_7 = arith.constant 0 : index
    %c0_8 = arith.constant 0 : index
    %17 = vector.load %arg3[%16, %c0_6, %c0_7, %c0_8] : memref<2x3x384x128xbf16, #tpu.memory_space<vmem>>, vector<1x1x384x128xbf16>
    %18 = vector.shape_cast %17 : vector<1x1x384x128xbf16> to vector<384x128xbf16>
    %19 = vector.shape_cast %15 : vector<1x16x16x384xbf16> to vector<256x384xbf16>
    %cst_9 = arith.constant dense<0.000000e+00> : vector<256x128xf32>
    %20 = tpu.matmul %19, %18, %cst_9 {dimension_numbers = #tpu.dot_dimension_numbers<[1], [0], [0], [1], [0, 0, 1, 1], [], []>} : vector<256x384xbf16>, vector<384x128xbf16>, vector<256x128xf32> -> vector<256x128xf32>
    %21 = arith.index_cast %arg1 : i32 to index
    %c1 = arith.constant 1 : index
    %c0_10 = arith.constant 0 : index
    %c0_11 = arith.constant 0 : index
    %22 = vector.load %arg3[%21, %c1, %c0_10, %c0_11] : memref<2x3x384x128xbf16, #tpu.memory_space<vmem>>, vector<1x1x384x128xbf16>
    %23 = vector.shape_cast %22 : vector<1x1x384x128xbf16> to vector<384x128xbf16>
    %24 = vector.shape_cast %12 : vector<1x16x16x384xbf16> to vector<256x384xbf16>
    %cst_12 = arith.constant dense<0.000000e+00> : vector<256x128xf32>
    %25 = tpu.matmul %24, %23, %cst_12 {dimension_numbers = #tpu.dot_dimension_numbers<[1], [0], [0], [1], [0, 0, 1, 1], [], []>} : vector<256x384xbf16>, vector<384x128xbf16>, vector<256x128xf32> -> vector<256x128xf32>
    %26 = arith.addf %20, %25 : vector<256x128xf32>
    %27 = vector.extract_strided_slice %12 {offsets = [0, 1, 0, 0], sizes = [1, 15, 16, 384], strides = [1, 1, 1, 1]} : vector<1x16x16x384xbf16> to vector<1x15x16x384xbf16>
    %28 = tpu.concatenate %27, %13 in 1 : vector<1x15x16x384xbf16>, vector<1x1x16x384xbf16> -> vector<1x16x16x384xbf16>
    %29 = arith.index_cast %arg1 : i32 to index
    %c2 = arith.constant 2 : index
    %c0_13 = arith.constant 0 : index
    %c0_14 = arith.constant 0 : index
    %30 = vector.load %arg3[%29, %c2, %c0_13, %c0_14] : memref<2x3x384x128xbf16, #tpu.memory_space<vmem>>, vector<1x1x384x128xbf16>
    %31 = vector.shape_cast %30 : vector<1x1x384x128xbf16> to vector<384x128xbf16>
    %32 = vector.shape_cast %28 : vector<1x16x16x384xbf16> to vector<256x384xbf16>
    %cst_15 = arith.constant dense<0.000000e+00> : vector<256x128xf32>
    %33 = tpu.matmul %32, %31, %cst_15 {dimension_numbers = #tpu.dot_dimension_numbers<[1], [0], [0], [1], [0, 0, 1, 1], [], []>} : vector<256x384xbf16>, vector<384x128xbf16>, vector<256x128xf32> -> vector<256x128xf32>
    %34 = arith.addf %26, %33 : vector<256x128xf32>
    %cst_16 = arith.constant 0.000000e+00 : f32
    %35 = vector.broadcast %cst_16 : f32 to vector<256x128xf32>
    %36 = arith.maximumf %34, %35 : vector<256x128xf32>
    %37 = arith.truncf %36 : vector<256x128xf32> to vector<256x128xbf16>
    %38 = arith.index_cast %arg1 : i32 to index
    %c0_17 = arith.constant 0 : index
    %c0_18 = arith.constant 0 : index
    %39 = vector.load %arg4[%38, %c0_17, %c0_18] : memref<2x128x128xbf16, #tpu.memory_space<vmem>>, vector<1x128x128xbf16>
    %40 = vector.shape_cast %39 : vector<1x128x128xbf16> to vector<128x128xbf16>
    %cst_19 = arith.constant dense<0.000000e+00> : vector<256x128xf32>
    %41 = tpu.matmul %37, %40, %cst_19 {dimension_numbers = #tpu.dot_dimension_numbers<[1], [0], [0], [1], [0, 0, 1, 1], [], []>} : vector<256x128xbf16>, vector<128x128xbf16>, vector<256x128xf32> -> vector<256x128xf32>
    %42 = vector.shape_cast %41 : vector<256x128xf32> to vector<1x16x16x128xf32>
    %43 = arith.addf %3, %42 : vector<1x16x16x128xf32>
    %c0_20 = arith.constant 0 : index
    %c0_21 = arith.constant 0 : index
    %c0_22 = arith.constant 0 : index
    %c0_23 = arith.constant 0 : index
    %44 = vector.load %arg6[%c0_20, %c0_21, %c0_22, %c0_23] : memref<1x16x16x128xf32, #tpu.memory_space<vmem>>, vector<1x16x16x128xf32>
    tpu.vector_store %arg6[%c0_20, %c0_21, %c0_22, %c0_23], %43 {strides = array<i32>} : memref<1x16x16x128xf32, #tpu.memory_space<vmem>>, vector<1x16x16x128xf32>,
    %c1_i32 = arith.constant 1 : i32
    %45 = arith.cmpi eq, %arg1, %c1_i32 : i32
    %46 = arith.extui %45 : i1 to i32
    %c0_i32_24 = arith.constant 0 : i32
    %47 = arith.cmpi ne, %46, %c0_i32_24 : i32
    scf.if %47 {
      %cst_25 = arith.constant 0.000000e+00 : f32
      %48 = vector.broadcast %cst_25 : f32 to vector<1x16x16x128xf32>
      %49 = arith.maximumf %43, %48 : vector<1x16x16x128xf32>
      %c0_26 = arith.constant 0 : index
      %c0_27 = arith.constant 0 : index
      %c0_28 = arith.constant 0 : index
      %c0_29 = arith.constant 0 : index
      %50 = vector.load %arg5[%c0_26, %c0_27, %c0_28, %c0_29] : memref<1x16x16x128xf32, #tpu.memory_space<vmem>>, vector<1x16x16x128xf32>
      tpu.vector_store %arg5[%c0_26, %c0_27, %c0_28, %c0_29], %49 {strides = array<i32>} : memref<1x16x16x128xf32, #tpu.memory_space<vmem>>, vector<1x16x16x128xf32>,
    } else {
    }
    return
  }
  func.func @transform_0(%arg0: i32, %arg1: i32) -> (i32, i32, i32, i32) {
    %c0_i32 = arith.constant 0 : i32
    %c0_i32_0 = arith.constant 0 : i32
    %c0_i32_1 = arith.constant 0 : i32
    %c0_i32_2 = arith.constant 0 : i32
    return %arg0, %c0_i32, %c0_i32_0, %c0_i32_1 : i32, i32, i32, i32
  }
  func.func @transform_1(%arg0: i32, %arg1: i32) -> (i32, i32, i32, i32) {
    %c0_i32 = arith.constant 0 : i32
    %c0_i32_0 = arith.constant 0 : i32
    %c0_i32_1 = arith.constant 0 : i32
    %c0_i32_2 = arith.constant 0 : i32
    %c0_i32_3 = arith.constant 0 : i32
    return %c0_i32, %c0_i32_0, %c0_i32_1, %c0_i32_2 : i32, i32, i32, i32
  }
  func.func @transform_2(%arg0: i32, %arg1: i32) -> (i32, i32, i32) {
    %c0_i32 = arith.constant 0 : i32
    %c0_i32_0 = arith.constant 0 : i32
    %c0_i32_1 = arith.constant 0 : i32
    %c0_i32_2 = arith.constant 0 : i32
    return %c0_i32, %c0_i32_0, %c0_i32_1 : i32, i32, i32
  }
  func.func @transform_3(%arg0: i32, %arg1: i32) -> (i32, i32, i32, i32) {
    %c0_i32 = arith.constant 0 : i32
    %c0_i32_0 = arith.constant 0 : i32
    %c0_i32_1 = arith.constant 0 : i32
    %c0_i32_2 = arith.constant 0 : i32
    return %arg0, %c0_i32, %c0_i32_0, %c0_i32_1 : i32, i32, i32, i32
  }
}

</mosaic_0001>

<bundles_post_ra>
// kernel: residual_stack_fused.1
= control target key start
LH: loop header
LB: loop body
LE: loop exit
PB: predicated region body
PF: predicated region fallthrough
CT: control target
= control target key end

     0   :  { %s3811_s12 = smov 0   ;;  %s3813_s13 = smov 0   ;;  %s4902_s0 = inlined_call_operand.vmem [shape: f32[2,16,16,128], index: 0, kind: input, shape index: {}]   ;;  %s4903_s1 = inlined_call_operand.vmem [shape: bf16[2,3,384,128], index: 1, kind: input, shape index: {}]   ;;  %s4904_s2 = inlined_call_operand.vmem [shape: bf16[2,128,128], index: 2, kind: input, shape index: {}]   ;;  %s4905_s3 = inlined_call_operand.vmem [shape: f32[2,16,16,128], index: 3, kind: output, shape index: {}]  }
   0x1   :  { %s3815_s14 = smov 0   ;;  %s3817_s15 = smov 0  }
   0x2   :  { %s3819_s16 = smov 0  }
   0x3 LB: > { %s22_s17 = sadd.s32 1, %s3780_s14  ;;  %s25_s18 = sadd.s32 1, %s3784_s15  ;;  %s3788_s16 = sphi %s3819_s16, %s13_s16   ;;  %s3784_s15 = sphi %s3817_s15, %s4923_s15   ;;  %s3780_s14 = sphi %s3815_s14, %s4922_s14   ;;  %s3776_s13 = sphi %s3813_s13, %s4921_s13   ;;  %s3772_s12 = sphi %s3811_s12, %s4920_s12  }
   0x4   : > { %p23_p0 = scmp.ge.s32.totalorder %s22_s17, 2  ;;  %p2619_p1 = scmp.ge.s32.totalorder %s3788_s16, 1 }
   0x5   : > { %p149_p2 = scmp.lt.s32.totalorder %s3788_s16, 5 }
   0x6   : > { %s4925_s17 = smov (%p23_p0, %s22_s17), 0  ;;  %s4927_s18 = smov (!%p23_p0, %s25_s18), %s3784_s15 }
   0x7   : > { %p150_p3 = pnand %p2619_p1, %p149_p2  ;;  %p27_p4 = scmp.ge.s32.totalorder %s4927_s18, 2 }
   0x8   : > { %p173_p5 = scmp.lt.s32.totalorder (!%p150_p3), %s3776_s13, 1  ;;  %p2624_p6 = scmp.ne.s32.totalorder (!%p150_p3), %s3772_s12, 0 }
   0x9   : > { %s4929_s18 = smov (%p27_p4, %s4927_s18), 0  ;;  %153 = sbr.rel (%p150_p3) target bundleno = 828 (0x33c), region = 32 }
  0x10   : > { %s4931_s13 = smov (!%p173_p5, %s3776_s13), 1  ;;  %187 = sbr.rel (%p2624_p6) target bundleno = 36 (0x24), region = 36 }
  0x11   : > { %s2809_s19 = sshll.u32 %s4931_s13, 8 }
  0x12   : > { %s3846_s22 = scalar_lea.vmem %s4902_s0, %s2809_s19  ;;  %s3851_s25 = scalar_lea.vmem %s4905_s3, %s2809_s19 }
  0x13   : > { %v188_v0 = vld [vmem:[%s3846_s22] sm:$0xff] (!%p2624_p6)  ;;  %v189_v1 = vld [vmem:[%s3846_s22 + $0x8] sm:$0xff] (!%p2624_p6)  ;;  %v190_v2 = vld [vmem:[%s3846_s22 + $0x10] sm:$0xff] (!%p2624_p6) }
  0x14   : > { %220 = vst [vmem:[#allocation2] sm:$0xff] (!%p2624_p6), %v188_v0  ;;  %221 = vst [vmem:[#allocation2 + $0x8] sm:$0xff] (!%p2624_p6), %v189_v1  ;;  %v191_v3 = vld [vmem:[%s3846_s22 + $0x18] sm:$0xff] (!%p2624_p6)  ;;  %v192_v4 = vld [vmem:[%s3846_s22 + $0x20] sm:$0xff] (!%p2624_p6) }
  0x15   : > { %222 = vst [vmem:[#allocation2 + $0x10] sm:$0xff] (!%p2624_p6), %v190_v2  ;;  %v193_v5 = vld [vmem:[%s3846_s22 + $0x28] sm:$0xff] (!%p2624_p6)  ;;  %223 = vst [vmem:[#allocation2 + $0x18] sm:$0xff] (!%p2624_p6), %v191_v3  ;;  %v194_v6 = vld [vmem:[%s3846_s22 + $0x30] sm:$0xff] (!%p2624_p6) }
  0x16   : > { %224 = vst [vmem:[#allocation2 + $0x20] sm:$0xff] (!%p2624_p6), %v192_v4  ;;  %225 = vst [vmem:[#allocation2 + $0x28] sm:$0xff] (!%p2624_p6), %v193_v5  ;;  %v195_v7 = vld [vmem:[%s3846_s22 + $0x38] sm:$0xff] (!%p2624_p6)  ;;  %v196_v8 = vld [vmem:[%s3846_s22 + $0x40] sm:$0xff] (!%p2624_p6) }
  0x17   : > { %226 = vst [vmem:[#allocation2 + $0x30] sm:$0xff] %v194_v6  ;;  %227 = vst [vmem:[#allocation2 + $0x38] sm:$0xff] %v195_v7  ;;  %v197_v9 = vld [vmem:[%s3846_s22 + $0x48] sm:$0xff]  ;;  %v198_v10 = vld [vmem:[%s3846_s22 + $0x50] sm:$0xff] }
  0x18   : > { %228 = vst [vmem:[#allocation2 + $0x40] sm:$0xff] %v196_v8  ;;  %v199_v11 = vld [vmem:[%s3846_s22 + $0x58] sm:$0xff]  ;;  %229 = vst [vmem:[#allocation2 + $0x48] sm:$0xff] %v197_v9  ;;  %v200_v12 = vld [vmem:[%s3846_s22 + $0x60] sm:$0xff] }
  0x19   : > { %230 = vst [vmem:[#allocation2 + $0x50] sm:$0xff] %v198_v10  ;;  %231 = vst [vmem:[#allocation2 + $0x58] sm:$0xff] %v199_v11  ;;  %v201_v13 = vld [vmem:[%s3846_s22 + $0x68] sm:$0xff]  ;;  %v202_v14 = vld [vmem:[%s3846_s22 + $0x70] sm:$0xff] }
  0x1a   : > { %232 = vst [vmem:[#allocation2 + $0x60] sm:$0xff] %v200_v12  ;;  %233 = vst [vmem:[#allocation2 + $0x68] sm:$0xff] %v201_v13  ;;  %v203_v15 = vld [vmem:[%s3846_s22 + $0x78] sm:$0xff]  ;;  %v204_v16 = vld [vmem:[%s3846_s22 + $0x80] sm:$0xff] }
  0x1b   : > { %234 = vst [vmem:[#allocation2 + $0x70] sm:$0xff] %v202_v14  ;;  %v205_v17 = vld [vmem:[%s3846_s22 + $0x88] sm:$0xff]  ;;  %235 = vst [vmem:[#allocation2 + $0x78] sm:$0xff] %v203_v15  ;;  %v206_v18 = vld [vmem:[%s3846_s22 + $0x90] sm:$0xff] }
  0x1c   : > { %236 = vst [vmem:[#allocation2 + $0x80] sm:$0xff] %v204_v16  ;;  %237 = vst [vmem:[#allocation2 + $0x88] sm:$0xff] %v205_v17  ;;  %v207_v19 = vld [vmem:[%s3846_s22 + $0x98] sm:$0xff]  ;;  %v208_v20 = vld [vmem:[%s3846_s22 + $0xa0] sm:$0xff] }
  0x1d   : > { %238 = vst [vmem:[#allocation2 + $0x90] sm:$0xff] %v206_v18  ;;  %239 = vst [vmem:[#allocation2 + $0x98] sm:$0xff] %v207_v19  ;;  %v209_v21 = vld [vmem:[%s3846_s22 + $0xa8] sm:$0xff]  ;;  %v210_v22 = vld [vmem:[%s3846_s22 + $0xb0] sm:$0xff] }
  0x1e   : > { %240 = vst [vmem:[#allocation2 + $0xa0] sm:$0xff] %v208_v20  ;;  %v211_v23 = vld [vmem:[%s3846_s22 + $0xb8] sm:$0xff]  ;;  %241 = vst [vmem:[#allocation2 + $0xa8] sm:$0xff] %v209_v21  ;;  %v212_v24 = vld [vmem:[%s3846_s22 + $0xc0] sm:$0xff] }
  0x1f   : > { %242 = vst [vmem:[#allocation2 + $0xb0] sm:$0xff] %v210_v22  ;;  %243 = vst [vmem:[#allocation2 + $0xb8] sm:$0xff] %v211_v23  ;;  %v213_v25 = vld [vmem:[%s3846_s22 + $0xc8] sm:$0xff]  ;;  %v214_v26 = vld [vmem:[%s3846_s22 + $0xd0] sm:$0xff] }
  0x20   : > { %244 = vst [vmem:[#allocation2 + $0xc0] sm:$0xff] %v212_v24  ;;  %245 = vst [vmem:[#allocation2 + $0xc8] sm:$0xff] %v213_v25  ;;  %v215_v27 = vld [vmem:[%s3846_s22 + $0xd8] sm:$0xff]  ;;  %v216_v28 = vld [vmem:[%s3846_s22 + $0xe0] sm:$0xff] }
  0x21   : > { %246 = vst [vmem:[#allocation2 + $0xd0] sm:$0xff] %v214_v26  ;;  %v217_v29 = vld [vmem:[%s3846_s22 + $0xe8] sm:$0xff]  ;;  %247 = vst [vmem:[#allocation2 + $0xd8] sm:$0xff] %v215_v27  ;;  %v218_v30 = vld [vmem:[%s3846_s22 + $0xf0] sm:$0xff] }
  0x22   : > { %248 = vst [vmem:[#allocation2 + $0xe0] sm:$0xff] %v216_v28  ;;  %249 = vst [vmem:[#allocation2 + $0xe8] sm:$0xff] %v217_v29  ;;  %v219_v31 = vld [vmem:[%s3846_s22 + $0xf8] sm:$0xff] }
  0x23   : > { %250 = vst [vmem:[#allocation2 + $0xf0] sm:$0xff] %v218_v30  ;;  %251 = vst [vmem:[#allocation2 + $0xf8] sm:$0xff] %v219_v31 }
  0x24 PF: > { %s2811_s26 = smul.u32 576, %s3772_s12  ;;  %vm527_vm0 = vcmask 1047552   ;;  %vm528_vm1 = vsmask.f32 7424  ;;  %vm461_vm3 = vsmask.f32 256 }
  0x25   : > { %vm3892_vm2 = vmand %vm527_vm0, %vm528_vm1  ;;  %vm460_vm4 = vcmask 1040384   ;;  %v260_v28 = vld [vmem:[#allocation2 + $0x40] sm:$0xff]  ;;  %v261_v29 = vld [vmem:[#allocation2 + $0x48] sm:$0xff]  ;;  %v3790_v36 = vmov 0   ;;  %s2812_s30 = sshll.u32 %s3772_s12, 6  ;;  %p2806_p7 = scmp.ne.s32.totalorder %s3772_s12, 1 }
  0x26   : > { %s3890_s29 = scalar_lea.vmem %s4903_s1, %s2811_s26  ;;  %vm3925_vm5 = vmand %vm460_vm4, %vm461_vm3  ;;  %v292_v30 = vmax.f32 %v260_v28, 0.0  ;;  %v293_v31 = vmax.f32 %v261_v29, 0.0  ;;  %v272_v29 = vld [vmem:[#allocation2 + $0xa0] sm:$0xff]  ;;  %s4410_s6 = scalar_lea.vmem %s4904_s2, %s2812_s30 }
  0x27   : > { %v3638_v37 = vld [vmem:[%s3890_s29 + $0x100] sm:$0xff]   ;;  %v3641_v42 = vld [vmem:[%s3890_s29 + $0x108] sm:$0xff]   ;;  %v3644_v48 = vld [vmem:[%s3890_s29 + $0x110] sm:$0xff]  }
  0x28   : > { %v252_v32 = vld [vmem:[#allocation2] sm:$0xff]  ;;  %v253_v33 = vld [vmem:[#allocation2 + $0x8] sm:$0xff]  ;;  %2813 = vmatprep.subr.bf16.mxu0 %v3638_v37  ;;  %v3645_v50 = vld [vmem:[%s3890_s29 + $0x150] sm:$0xff]  }
  0x29   : > { %v284_v34 = vmax.f32 %v252_v32, 0.0  ;;  %v285_v35 = vmax.f32 %v253_v33, 0.0  ;;  %v3639_v39 = vld [vmem:[%s3890_s29 + $0x140] sm:$0xff]   ;;  %v3642_v44 = vld [vmem:[%s3890_s29 + $0x148] sm:$0xff]   ;;  %v254_v47 = vld [vmem:[#allocation2 + $0x10] sm:$0xff] }
  0x2a   : > { %v3640_v40 = vld [vmem:[%s3890_s29 + $0xc0] sm:$0xff]   ;;  %3245 = vmatprep.subr.bf16.mxu1 %v3639_v39  ;;  %v3643_v45 = vld [vmem:[%s3890_s29 + $0xc8] sm:$0xff]   ;;  %v255_v49 = vld [vmem:[#allocation2 + $0x18] sm:$0xff]  ;;  %v286_v56 = vmax.f32 %v254_v47, 0.0 }
  0x2b   : > { %v3897_v38 = vpack.c.bf16 %v285_v35, %v284_v34  ;;  %2814 = vmatpush3.bf16.msra.mxu0 %v3640_v40  ;;  %3246 = vmatpush3.bf16.msra.mxu1 %v3639_v39  ;;  %v3646_v52 = vld [vmem:[%s3890_s29 + $0xd0] sm:$0xff]   ;;  %v3647_v53 = vld [vmem:[%s3890_s29 + $0x118] sm:$0xff]   ;;  %v287_v58 = vmax.f32 %v255_v49, 0.0  ;;  %v3650_v59 = vld [vmem:[%s3890_s29 + $0x120] sm:$0xff]  }
  0x2c   : > { %2815 = vmatprep.subr.bf16.mxu0 %v3641_v42  ;;  %3247 = vmatprep.subr.bf16.mxu1 %v3642_v44  ;;  %v3648_v55 = vld [vmem:[%s3890_s29 + $0x158] sm:$0xff]   ;;  %v3651_v60 = vld [vmem:[%s3890_s29 + $0x160] sm:$0xff]   ;;  %v3653_v63 = vld [vmem:[%s3890_s29 + $0x128] sm:$0xff]   ;;  %v3956_v42 = vpack.c.bf16 %v293_v31, %v292_v30 }
  0x2d   : > { %824 = vmatprep.mubr.bf16.mxu0 %v3897_v38  ;;  %v333_v41 = vshrl.u32 %v3897_v38, 16  ;;  %v336_v43 = vshll.u32 %v3897_v38, 16  ;;  %v3649_v57 = vld [vmem:[%s3890_s29 + $0xd8] sm:$0xff]   ;;  %v3652_v61 = vld [vmem:[%s3890_s29 + $0xe0] sm:$0xff]   ;;  %v3921_v62 = vpack.c.bf16 %v287_v58, %v286_v56  ;;  %v3654_v0 = vld [vmem:[%s3890_s29 + $0x168] sm:$0xff]  }
  0x2e   : > { %v3655_v2 = vld [vmem:[%s3890_s29 + $0xe8] sm:$0xff]   ;;  %v3656_v4 = vld [vmem:[%s3890_s29 + $0x130] sm:$0xff]   ;;  %v256_v8 = vld [vmem:[#allocation2 + $0x20] sm:$0xff] }
  0x2f   : > { %v479_v46 = vrot.slane %v336_v43, 1  ;;  %2816 = vmatpush3.bf16.msra.mxu0 %v3643_v45  ;;  %3248 = vmatpush3.bf16.msra.mxu1 %v3642_v44  ;;  %v343_v3 = vshll.u32 %v3921_v62, 16  ;;  %v3657_v5 = vld [vmem:[%s3890_s29 + $0x170] sm:$0xff]   ;;  %v335_v6 = vrot.slane %v333_v41, 7  ;;  %v340_v7 = vshrl.u32 %v3921_v62, 16  ;;  %v3659_v11 = vld [vmem:[%s3890_s29 + $0x138] sm:$0xff]  }
  0x30   : > { %2817 = vmatprep.subr.bf16.mxu0 %v3644_v48  ;;  %3249 = vmatprep.subr.bf16.mxu1 %v3645_v50  ;;  %v3658_v9 = vld [vmem:[%s3890_s29 + $0xf0] sm:$0xff]   ;;  %v3660_v12 = vld [vmem:[%s3890_s29 + $0x178] sm:$0xff]   ;;  %v288_v14 = vmax.f32 %v256_v8, 0.0  ;;  %v257_v15 = vld [vmem:[#allocation2 + $0x28] sm:$0xff] }
  0x31   : > { %v480_v51 = vor.u32 %v479_v46, %v333_v41  ;;  %v481_v10 = vrot.slane %v343_v3, 1  ;;  %v338_v13 = vor.u32 %v336_v43, %v335_v6  ;;  %v258_v16 = vld [vmem:[#allocation2 + $0x30] sm:$0xff]  ;;  %v259_v17 = vld [vmem:[#allocation2 + $0x38] sm:$0xff]  ;;  %v289_v20 = vmax.f32 %v257_v15, 0.0  ;;  %v3662_v24 = vld [vmem:[%s3890_s29 + $0x40] sm:$0xff]  }
  0x32   : > { %v3661_v18 = vld [vmem:[%s3890_s29 + $0xf8] sm:$0xff]   ;;  %v290_v21 = vmax.f32 %v258_v16, 0.0  ;;  %v291_v22 = vmax.f32 %v259_v17, 0.0  ;;  %v342_v26 = vrot.slane %v340_v7, 7  ;;  %v262_v32 = vld [vmem:[#allocation2 + $0x50] sm:$0xff]  ;;  %v3663_v40 = vld [vmem:[%s3890_s29] sm:$0xff]  }
  0x33   : > { %v3913_v54 = vsel %vm3892_vm2, %v480_v51, 0  ;;  %2818 = vmatpush3.bf16.msra.mxu0 %v3646_v52  ;;  %3250 = vmatpush3.bf16.msra.mxu1 %v3645_v50  ;;  %v482_v19 = vor.u32 %v481_v10, %v340_v7  ;;  %v3940_v23 = vsel %vm3925_vm5, 0, %v338_v13  ;;  %v3943_v25 = vpack.c.bf16 %v289_v20, %v288_v14  ;;  %v263_v33 = vld [vmem:[#allocation2 + $0x58] sm:$0xff]  ;;  %v3664_v48 = vld [vmem:[%s3890_s29 + $0x48] sm:$0xff]   ;;  %v264_v49 = vld [vmem:[#allocation2 + $0x60] sm:$0xff] }
  0x34   : > { %3261 = vmatprep.mubr.bf16.mxu1 %v3913_v54  ;;  %2819 = vmatprep.subr.bf16.mxu0 %v3647_v53  ;;  %v3945_v27 = vpack.c.bf16 %v291_v22, %v290_v21  ;;  %v294_v43 = vmax.f32 %v262_v32, 0.0  ;;  %v295_v44 = vmax.f32 %v263_v33, 0.0  ;;  %v345_v46 = vor.u32 %v343_v3, %v342_v26  ;;  %v265_v53 = vld [vmem:[#allocation2 + $0x68] sm:$0xff]  ;;  %v266_v58 = vld [vmem:[#allocation2 + $0x70] sm:$0xff]  ;;  %v268_v10 = vld [vmem:[#allocation2 + $0x80] sm:$0xff] }
  0x35   : > { %3251 = vmatprep.subr.bf16.mxu1 %v3648_v55  ;;  %v3949_v34 = vsel %vm3892_vm2, %v482_v19, 0  ;;  %v347_v35 = vshrl.u32 %v3943_v25, 16  ;;  %v350_v37 = vshll.u32 %v3943_v25, 16  ;;  %v361_v50 = vshrl.u32 %v3956_v42, 16  ;;  %v271_v17 = vld [vmem:[#allocation2 + $0x98] sm:$0xff]  ;;  %v3667_v19 = vld [vmem:[%s3890_s29 + $0x10] sm:$0xff]  }
  0x36   : > { %v357_v39 = vshll.u32 %v3945_v27, 16  ;;  %v354_v41 = vshrl.u32 %v3945_v27, 16  ;;  %v364_v51 = vshll.u32 %v3956_v42, 16  ;;  %v3965_v52 = vpack.c.bf16 %v295_v44, %v294_v43  ;;  %v3668_v30 = vld [vmem:[%s3890_s29 + $0x58] sm:$0xff]   ;;  %v273_v43 = vld [vmem:[#allocation2 + $0xa8] sm:$0xff]  ;;  %v3704_v1 = vld [vmem:[%s3890_s29 + $0x210] sm:$0xff]  }
  0x37   : > { %2820 = vmatpush3.bf16.msra.mxu0 %v3649_v57  ;;  %3252 = vmatpush3.bf16.msra.mxu1 %v3648_v55  ;;  %v483_v45 = vrot.slane %v350_v37, 1  ;;  %v296_v55 = vmax.f32 %v264_v49, 0.0  ;;  %v297_v57 = vmax.f32 %v265_v53, 0.0  ;;  %v3982_v3 = vsel %vm3925_vm5, 0, %v345_v46  ;;  %v3670_v49 = vld [vmem:[%s3890_s29 + $0x60] sm:$0xff]  }
  0x38   : > { %2821 = vmatprep.subr.bf16.mxu0 %v3650_v59  ;;  %3253 = vmatprep.subr.bf16.mxu1 %v3651_v60  ;;  %v485_v47 = vrot.slane %v357_v39, 1  ;;  %v349_v7 = vrot.slane %v347_v35, 7  ;;  %v368_v8 = vshrl.u32 %v3965_v52, 16  ;;  %v300_v16 = vmax.f32 %v268_v10, 0.0 }
  0x39   : > { %v484_v56 = vor.u32 %v483_v45, %v347_v35  ;;  %v303_v32 = vmax.f32 %v271_v17, 0.0  ;;  %v305_v53 = vmax.f32 %v273_v43, 0.0 }
  0x3a   : > { %v486_v59 = vor.u32 %v485_v47, %v354_v41  ;;  %v352_v33 = vor.u32 %v350_v37, %v349_v7  ;;  %v304_v47 = vmax.f32 %v272_v29, 0.0  ;;  %v356_v37 = vrot.slane %v354_v41, 7 }
  0x3b   : > { %2822 = vmatpush3.bf16.msra.mxu0 %v3652_v61  ;;  %3254 = vmatpush3.bf16.msra.mxu1 %v3651_v60  ;;  %v3665_v60 = vld [vmem:[%s3890_s29 + $0x8] sm:$0xff]   ;;  %v487_v61 = vrot.slane %v364_v51, 1  ;;  %v370_v43 = vrot.slane %v368_v8, 7 }
  0x3c   : > { %2823 = vmatprep.subr.bf16.mxu0 %v3653_v63  ;;  %3255 = vmatprep.subr.bf16.mxu1 %v3654_v0  ;;  %v371_v63 = vshll.u32 %v3965_v52, 16  ;;  %v4051_v7 = vpack.c.bf16 %v305_v53, %v304_v47  ;;  %v3674_v47 = vld [vmem:[%s3890_s29 + $0x70] sm:$0xff]  }
  0x3d   : > { %v488_v6 = vor.u32 %v487_v61, %v361_v50  ;;  %v3675_v53 = vld [vmem:[%s3890_s29 + $0x30] sm:$0xff]  }
  0x3e   : > { %v489_v13 = vrot.slane %v371_v63, 1 }
  0x3f   : > { %2824 = vmatpush3.bf16.msra.mxu0 %v3655_v2  ;;  %3256 = vmatpush3.bf16.msra.mxu1 %v3654_v0  ;;  %v267_v0 = vld [vmem:[#allocation2 + $0x78] sm:$0xff]  ;;  %v3978_v2 = vsel %vm3892_vm2, %v484_v56, 0  ;;  %v4002_v22 = vsel %vm3892_vm2, %v488_v6, 0  ;;  %v3671_v6 = vld [vmem:[%s3890_s29 + $0x20] sm:$0xff]  }
  0x40   : > { %2825 = vmatprep.subr.bf16.mxu0 %v3656_v4  ;;  %3257 = vmatprep.subr.bf16.mxu1 %v3657_v5  ;;  %v3666_v4 = vld [vmem:[%s3890_s29 + $0x50] sm:$0xff]   ;;  %v299_v15 = vmax.f32 %v267_v0, 0.0  ;;  %v490_v35 = vor.u32 %v489_v13, %v368_v8  ;;  %v277_v13 = vld [vmem:[#allocation2 + $0xc8] sm:$0xff] }
  0x43   : > { %2826 = vmatpush3.bf16.msra.mxu0 %v3658_v9  ;;  %3258 = vmatpush3.bf16.msra.mxu1 %v3657_v5  ;;  %v3985_v5 = vpack.c.bf16 %v297_v57, %v296_v55  ;;  %v298_v9 = vmax.f32 %v266_v58, 0.0  ;;  %v363_v55 = vrot.slane %v361_v50, 7  ;;  %v274_v57 = vld [vmem:[#allocation2 + $0xb0] sm:$0xff]  ;;  %v275_v58 = vld [vmem:[#allocation2 + $0xb8] sm:$0xff] }
  0x44   : > { %2827 = vmatprep.subr.bf16.mxu0 %v3659_v11  ;;  %3259 = vmatprep.subr.bf16.mxu1 %v3660_v12  ;;  %v269_v11 = vld [vmem:[#allocation2 + $0x88] sm:$0xff]  ;;  %v306_v10 = vmax.f32 %v274_v57, 0.0 }
  0x45   : > { %v378_v14 = vshll.u32 %v3985_v5, 16  ;;  %v375_v20 = vshrl.u32 %v3985_v5, 16  ;;  %v301_v21 = vmax.f32 %v269_v11, 0.0  ;;  %v4006_v26 = vpack.c.bf16 %v299_v15, %v298_v9 }
  0x46   : > { %v359_v9 = vor.u32 %v357_v39, %v356_v37  ;;  %v307_v11 = vmax.f32 %v275_v58, 0.0  ;;  %v366_v15 = vor.u32 %v364_v51, %v363_v55  ;;  %v280_v58 = vld [vmem:[#allocation2 + $0xe0] sm:$0xff] }
  0x47   : > { %2828 = vmatpush3.bf16.msra.mxu0 %v3661_v18  ;;  %3260 = vmatpush3.bf16.msra.mxu1 %v3660_v12  ;;  %v270_v12 = vld [vmem:[#allocation2 + $0x90] sm:$0xff]  ;;  %v3996_v18 = vsel %vm3892_vm2, %v486_v59, 0  ;;  %v4009_v31 = vpack.c.bf16 %v301_v21, %v300_v16  ;;  %v4034_v59 = vsel %vm3925_vm5, 0, %v352_v33  ;;  %v382_v41 = vshrl.u32 %v4006_v26, 16 }
  0x48   : > { %2949 = vmatprep.subr.bf16.mxu1 %v3662_v24  ;;  %v491_v24 = vrot.slane %v378_v14, 1  ;;  %v302_v28 = vmax.f32 %v270_v12, 0.0  ;;  %v276_v12 = vld [vmem:[#allocation2 + $0xc0] sm:$0xff]  ;;  %v4906_v21 = vshll.u32 %v4051_v7, 16  ;;  %v4072_v29 = vsel %vm3925_vm5, 0, %v359_v9  ;;  %v281_v9 = vld [vmem:[#allocation2 + $0xe8] sm:$0xff] }
  0x49   : > { %v392_v45 = vshll.u32 %v4009_v31, 16  ;;  %v389_v0 = vshrl.u32 %v4009_v31, 16  ;;  %v4079_v33 = vsel %vm3925_vm5, 0, %v366_v15  ;;  %v3676_v15 = vld [vmem:[%s3890_s29 + $0x78] sm:$0xff]  }
  0x4a   : > { %825 = vmatmul.mubr.bf16.vlgmr.msra.gmra.mrb[0].mxu0 %v3940_v23  ;;  %3262 = vmatmul.mubr.bf16.vlgmr.msra.gmra.mrb[0].mxu1 %v3949_v34  ;;  %v492_v44 = vor.u32 %v491_v24, %v375_v20  ;;  %v4023_v46 = vpack.c.bf16 %v303_v32, %v302_v28  ;;  %v308_v24 = vmax.f32 %v276_v12, 0.0  ;;  %v309_v28 = vmax.f32 %v277_v13, 0.0  ;;  %v3673_v32 = vld [vmem:[%s3890_s29 + $0x28] sm:$0xff]   ;;  %v282_v13 = vld [vmem:[#allocation2 + $0xf0] sm:$0xff] }
  0x4b   : > { %2950 = vmatpush3.bf16.msra.mxu1 %v3663_v40  ;;  %832 = vmatprep.mubr.bf16.mxu0 %v3921_v62  ;;  %v385_v40 = vshll.u32 %v4006_v26, 16  ;;  %v499_v8 = vrot.slane %v4906_v21, 1 }
  0x4c   : > { %2951 = vmatprep.subr.bf16.mxu1 %v3664_v48  ;;  %3265 = vmatprep.mubr.bf16.mxu1 %v3978_v2  ;;  %v3669_v48 = vld [vmem:[%s3890_s29 + $0x18] sm:$0xff]   ;;  %v4907_v56 = vshll.u32 %v4023_v46, 16  ;;  %v4045_v50 = vsel %vm3892_vm2, %v492_v44, 0  ;;  %v396_v16 = vshrl.u32 %v4023_v46, 16  ;;  %v278_v44 = vld [vmem:[#allocation2 + $0xd0] sm:$0xff]  ;;  %v4098_v57 = vpack.c.bf16 %v309_v28, %v308_v24 }
  0x4d   : > { %v493_v61 = vrot.slane %v385_v40, 1  ;;  %v310_v12 = vmax.f32 %v278_v44, 0.0  ;;  %v312_v28 = vmax.f32 %v280_v58, 0.0  ;;  %v3681_v44 = vld [vmem:[%s3890_s29 + $0x1c8] sm:$0xff]  }
  0x4e   : > { %v497_v17 = vrot.slane %v4907_v56, 1  ;;  %v314_v56 = vmax.f32 %v282_v13, 0.0  ;;  %v377_v13 = vrot.slane %v375_v20, 7 }
  0x4f   : > { %2952 = vmatpush3.bf16.msra.mxu1 %v3665_v60  ;;  %v4038_v60 = vsel %vm3892_vm2, %v490_v35, 0  ;;  %v494_v39 = vor.u32 %v493_v61, %v382_v41  ;;  %v3678_v61 = vld [vmem:[%s3890_s29 + $0x1c0] sm:$0xff]  }
  0x50   : > { %2953 = vmatprep.subr.bf16.mxu1 %v3666_v4  ;;  %v495_v4 = vrot.slane %v392_v45, 1  ;;  %v498_v35 = vor.u32 %v497_v17, %v396_v16  ;;  %3085 = vmatprep.subr.bf16.mxu0 %v3678_v61  ;;  %v373_v61 = vor.u32 %v371_v63, %v370_v43  ;;  %v3684_v63 = vld [vmem:[%s3890_s29 + $0x1d0] sm:$0xff]  }
  0x51   : > { %v4088_v37 = vsel %vm3892_vm2, %v494_v39, 0  ;;  %v420_v39 = vshll.u32 %v4098_v57, 16 }
  0x52   : > { %833 = vmatmul.mubr.bf16.gmra.mrb[4].mxu0 %v3982_v3  ;;  %3266 = vmatmul.mubr.bf16.gmra.mrb[4].mxu1 %v3996_v18  ;;  %v496_v51 = vor.u32 %v495_v4, %v389_v0 }
  0x53   : > { %840 = vmatprep.mubr.bf16.mxu0 %v3943_v25  ;;  %3269 = vmatprep.mubr.bf16.mxu1 %v4002_v22  ;;  %v503_v58 = vrot.slane %v420_v39, 1 }
  0x54   : > { %2954 = vmatpush3.bf16.msra.mxu1 %v3667_v19  ;;  %v3672_v19 = vld [vmem:[%s3890_s29 + $0x68] sm:$0xff]   ;;  %v4094_v55 = vsel %vm3892_vm2, %v496_v51, 0  ;;  %v3677_v51 = vld [vmem:[%s3890_s29 + $0x38] sm:$0xff]  }
  0x55   : > { %2955 = vmatprep.subr.bf16.mxu1 %v3668_v30  ;;  %v4074_v30 = vpack.c.bf16 %v307_v11, %v306_v10  ;;  %v3679_v10 = vld [vmem:[%s3890_s29 + $0x180] sm:$0xff]   ;;  %v4106_v11 = vsel %vm3892_vm2, %v498_v35, 0 }
  0x56   : > { %3086 = vmatpush3.bf16.msra.mxu0 %v3679_v10  ;;  %v4118_v35 = vld [vmem:[%s3890_s29 + $0x80] sm:$0xff]  }
  0x57   : > { %v410_v4 = vshrl.u32 %v4074_v30, 16  ;;  %3087 = vmatprep.subr.bf16.mxu0 %v3681_v44  ;;  %v3688_v44 = vld [vmem:[%s3890_s29 + $0x198] sm:$0xff]  }
  0x58   : > { %2956 = vmatpush3.bf16.msra.mxu1 %v3669_v48  ;;  %v403_v48 = vshrl.u32 %v4051_v7, 16 }
  0x59   : > { %2957 = vmatprep.subr.bf16.mxu1 %v3670_v49  ;;  %v279_v49 = vld [vmem:[#allocation2 + $0xd8] sm:$0xff] }
  0x5a   : > { %841 = vmatmul.mubr.bf16.gmra.mrb[8].mxu0 %v4034_v59  ;;  %3270 = vmatmul.mubr.bf16.gmra.mrb[8].mxu1 %v4038_v60  ;;  %v311_v17 = vmax.f32 %v279_v49, 0.0  ;;  %v500_v24 = vor.u32 %v499_v8, %v403_v48  ;;  %v3682_v49 = vld [vmem:[%s3890_s29 + $0x188] sm:$0xff]  }
  0x5b   : > { %848 = vmatprep.mubr.bf16.mxu0 %v3945_v27  ;;  %3273 = vmatprep.mubr.bf16.mxu1 %v4045_v50 }
  0x5c   : > { %2958 = vmatpush3.bf16.msra.mxu1 %v3671_v6  ;;  %v413_v6 = vshll.u32 %v4074_v30, 16  ;;  %v4126_v21 = vpack.c.bf16 %v311_v17, %v310_v12  ;;  %3088 = vmatpush3.bf16.msra.mxu0 %v3682_v49  ;;  %v4145_v12 = vsel %vm3925_vm5, 0, %v373_v61 }
  0x5d   : > { %2959 = vmatprep.subr.bf16.mxu1 %v3672_v19  ;;  %v283_v19 = vld [vmem:[#allocation2 + $0xf8] sm:$0xff]  ;;  %3089 = vmatprep.subr.bf16.mxu0 %v3684_v63 }
  0x5e   : > { %v315_v8 = vmax.f32 %v283_v19, 0.0  ;;  %v3685_v19 = vld [vmem:[%s3890_s29 + $0x190] sm:$0xff]  }
  0x60   : > { %2960 = vmatpush3.bf16.msra.mxu1 %v3673_v32  ;;  %v313_v32 = vmax.f32 %v281_v9, 0.0  ;;  %v4133_v9 = vsel %vm3892_vm2, %v500_v24, 0  ;;  %v4150_v17 = vpack.c.bf16 %v315_v8, %v314_v56  ;;  %v424_v24 = vshrl.u32 %v4126_v21, 16  ;;  %v3687_v56 = vld [vmem:[%s3890_s29 + $0x1d8] sm:$0xff]   ;;  %3090 = vmatpush3.bf16.msra.mxu0 %v3685_v19 }
  0x61   : > { %2961 = vmatprep.subr.bf16.mxu1 %v3674_v47  ;;  %v501_v47 = vrot.slane %v413_v6, 1  ;;  %3091 = vmatprep.subr.bf16.mxu0 %v3687_v56  ;;  %v380_v19 = vor.u32 %v378_v14, %v377_v13  ;;  %v3692_v56 = vld [vmem:[%s3890_s29 + $0x1e8] sm:$0xff]  }
  0x62   : > { %849 = vmatmul.mubr.bf16.gmra.mrb[12].mxu0 %v4072_v29  ;;  %3274 = vmatmul.mubr.bf16.gmra.mrb[12].mxu1 %v4088_v37  ;;  %v4135_v10 = vpack.c.bf16 %v313_v32, %v312_v28  ;;  %v384_v28 = vrot.slane %v382_v41, 7  ;;  %v4910_v49 = vshll.u32 %v4150_v17, 16  ;;  %v438_v63 = vshrl.u32 %v4150_v17, 16  ;;  %v3693_v14 = vld [vmem:[%s3890_s29 + $0x1a8] sm:$0xff]  }
  0x63   : > { %856 = vmatprep.mubr.bf16.mxu0 %v3956_v42  ;;  %3277 = vmatprep.mubr.bf16.mxu1 %v4094_v55  ;;  %v502_v43 = vor.u32 %v501_v47, %v410_v4  ;;  %v4198_v13 = vsel %vm3925_vm5, 0, %v380_v19 }
  0x64   : > { %2962 = vmatpush3.bf16.msra.mxu1 %v3675_v53  ;;  %v417_v53 = vshrl.u32 %v4098_v57, 16  ;;  %v4908_v20 = vshll.u32 %v4135_v10, 16  ;;  %v431_v61 = vshrl.u32 %v4135_v10, 16  ;;  %3092 = vmatpush3.bf16.msra.mxu0 %v3688_v44 }
  0x65   : > { %2963 = vmatprep.subr.bf16.mxu1 %v3676_v15  ;;  %v4909_v15 = vshll.u32 %v4126_v21, 16  ;;  %v4164_v32 = vsel %vm3892_vm2, %v502_v43, 0  ;;  %v3691_v43 = vld [vmem:[%s3890_s29 + $0x1a0] sm:$0xff]  }
  0x66   : > { %v507_v8 = vrot.slane %v4908_v20, 1  ;;  %v387_v20 = vor.u32 %v385_v40, %v384_v28 }
  0x67   : > { %v505_v47 = vrot.slane %v4909_v15, 1 }
  0x68   : > { %2964 = vmatpush3.bf16.msra.mxu1 %v3677_v51  ;;  %v504_v51 = vor.u32 %v503_v58, %v417_v53  ;;  %v3690_v58 = vld [vmem:[%s3890_s29 + $0x1e0] sm:$0xff]   ;;  %v508_v15 = vor.u32 %v507_v8, %v431_v61  ;;  %v4208_v40 = vsel %vm3925_vm5, 0, %v387_v20  ;;  %v3694_v8 = vld [vmem:[%s3890_s29 + $0x1f0] sm:$0xff]   ;;  %v3696_v20 = vld [vmem:[%s3890_s29 + $0x1f8] sm:$0xff]  }
  0x69   : > { %3293 = vmatprep.subr.bf16.mxu1 %v4118_v35  ;;  %v506_v44 = vor.u32 %v505_v47, %v424_v24  ;;  %3093 = vmatprep.subr.bf16.mxu0 %v3690_v58  ;;  %v391_v58 = vrot.slane %v389_v0, 7 }
  0x6a   : > { %857 = vmatmul.mubr.bf16.gmra.mrb[16].mxu0 %v4079_v33  ;;  %3278 = vmatmul.mubr.bf16.gmra.mrb[16].mxu1 %v4106_v11  ;;  %v4172_v41 = vsel %vm3892_vm2, %v504_v51, 0  ;;  %v509_v51 = vrot.slane %v4910_v49, 1  ;;  %v4212_v28 = vsel %vm3892_vm2, %v508_v15, 0  ;;  %v3697_v15 = vld [vmem:[%s3890_s29 + $0x1b8] sm:$0xff]  }
  0x6b   : > { %864 = vmatprep.mubr.bf16.mxu0 %v3965_v52  ;;  %3281 = vmatprep.mubr.bf16.mxu1 %v4133_v9  ;;  %v4204_v47 = vsel %vm3892_vm2, %v506_v44, 0  ;;  %v394_v0 = vor.u32 %v392_v45, %v391_v58  ;;  %v4915_v44 = vshll.u32 %v4023_v46, 16 }
  0x6c   : > { %3094 = vmatpush3.bf16.msra.mxu0 %v3691_v43  ;;  %v510_v49 = vor.u32 %v509_v51, %v438_v63  ;;  %v3695_v43 = vld [vmem:[%s3890_s29 + $0x1b0] sm:$0xff]   ;;  %v398_v51 = vrot.slane %v396_v16, 7 }
  0x6d   : > { %3095 = vmatprep.subr.bf16.mxu0 %v3692_v56  ;;  %v3683_v56 = vld [vmem:[%s3890_s29 + $0x88] sm:$0xff]  }
  0x6e   : > { %v4222_v19 = vsel %vm3892_vm2, %v510_v49, 0  ;;  %v4236_v49 = vsel %vm3925_vm5, 0, %v394_v0  ;;  %v401_v45 = vor.u32 %v4915_v44, %v398_v51  ;;  %v3700_v0 = vld [vmem:[%s3890_s29 + $0xb0] sm:$0xff]   ;;  %v419_v51 = vrot.slane %v417_v53, 7  ;;  %v4291_v44 = vld [vmem:[%s3890_s29 + $0x200] sm:$0xff]  }
  0x70   : > { %3096 = vmatpush3.bf16.msra.mxu0 %v3693_v14  ;;  %v3686_v14 = vld [vmem:[%s3890_s29 + $0x90] sm:$0xff]   ;;  %v4251_v16 = vsel %vm3925_vm5, 0, %v401_v45  ;;  %v426_v45 = vrot.slane %v424_v24, 7  ;;  %v433_v24 = vrot.slane %v431_v61, 7  ;;  %v4919_v61 = vshll.u32 %v4150_v17, 16 }
  0x71   : > { %3097 = vmatprep.subr.bf16.mxu0 %v3694_v8  ;;  %v405_v8 = vrot.slane %v403_v48, 7 }
  0x72   : > { %865 = vmatmul.mubr.bf16.gmra.mrb[20].mxu0 %v4145_v12  ;;  %3282 = vmatmul.mubr.bf16.gmra.mrb[20].mxu1 %v4164_v32 }
  0x73   : > { %872 = vmatprep.mubr.bf16.mxu0 %v3985_v5  ;;  %3285 = vmatprep.mubr.bf16.mxu1 %v4172_v41 }
  0x74   : > { %3098 = vmatpush3.bf16.msra.mxu0 %v3695_v43  ;;  %v3698_v43 = vld [vmem:[%s3890_s29 + $0xa0] sm:$0xff]  }
  0x75   : > { %3099 = vmatprep.subr.bf16.mxu0 %v3696_v20  ;;  %v412_v20 = vrot.slane %v410_v4, 7 }
  0x78   : > { %3100 = vmatpush3.bf16.msra.mxu0 %v3697_v15  ;;  %v415_v15 = vor.u32 %v413_v6, %v412_v20  ;;  %v422_v6 = vor.u32 %v420_v39, %v419_v51  ;;  %v4917_v39 = vshll.u32 %v4126_v21, 16 }
  0x7a   : > { %873 = vmatmul.mubr.bf16.gmra.mrb[24].mxu0 %v4198_v13  ;;  %3286 = vmatmul.mubr.bf16.gmra.mrb[24].mxu1 %v4204_v47  ;;  %v4279_v4 = vsel %vm3925_vm5, 0, %v415_v15  ;;  %v4295_v53 = vsel %vm3925_vm5, 0, %v422_v6  ;;  %v3711_v6 = vld [vmem:[%s4410_s6 + $0x8] sm:$0xff]  }
  0x7b   : > { %880 = vmatprep.mubr.bf16.mxu0 %v4006_v26  ;;  %3289 = vmatprep.mubr.bf16.mxu1 %v4212_v28 }
  0x82   : > { %881 = vmatmul.mubr.bf16.gmra.mrb[28].mxu0 %v4208_v40  ;;  %3290 = vmatmul.mubr.bf16.gmra.mrb[28].mxu1 %v4222_v19 }
  0x83   : > { %888 = vmatprep.mubr.bf16.mxu0 %v4009_v31  ;;  %1290 = vmatprep.mubr.bf16.mxu1 %v3790_v36 }
  0x8a   : > { %889 = vmatmul.mubr.bf16.gmra.mrb[32].mxu0 %v4236_v49  ;;  %1291 = vmatmul.mubr.bf16.vlgmr.msra.gmra.mrb[32].mxu1 %v3790_v36 }
  0x8b   : > { %3294 = vmatpush3.bf16.msra.mxu1 %v4118_v35  ;;  %896 = vmatprep.mubr.bf16.mxu0 %v4023_v46  ;;  %v3689_v35 = vld [vmem:[%s3890_s29 + $0x98] sm:$0xff]  }
  0x8c   : > { %1298 = vmatprep.mubr.bf16.mxu1 %v3897_v38  ;;  %3295 = vmatprep.subr.bf16.mxu1 %v3683_v56  ;;  %v4916_v38 = vshll.u32 %v4051_v7, 16 }
  0x8e   : > { %v408_v58 = vor.u32 %v4916_v38, %v405_v8 }
  0x8f   : > { %3296 = vmatpush3.bf16.msra.mxu1 %v3683_v56  ;;  %v3701_v56 = vld [vmem:[%s3890_s29 + $0xb8] sm:$0xff]  }
  0x90   : > { %3297 = vmatprep.subr.bf16.mxu1 %v3686_v14  ;;  %v4265_v48 = vsel %vm3925_vm5, 0, %v408_v58 }
  0x92   : > { %897 = vmatmul.mubr.bf16.gmra.mrb[36].mxu0 %v4251_v16  ;;  %1299 = vmatmul.mubr.bf16.gmra.mrb[36].mxu1 %v3940_v23  ;;  %v3699_v23 = vld [vmem:[%s3890_s29 + $0xa8] sm:$0xff]  }
  0x93   : > { %904 = vmatprep.mubr.bf16.mxu0 %v4051_v7  ;;  %1306 = vmatprep.mubr.bf16.mxu1 %v3921_v62 }
  0x94   : > { %3298 = vmatpush3.bf16.msra.mxu1 %v3686_v14  ;;  %v429_v14 = vor.u32 %v4917_v39, %v426_v45 }
  0x95   : > { %3299 = vmatprep.subr.bf16.mxu1 %v3689_v35 }
  0x96   : > { %v4308_v8 = vsel %vm3925_vm5, 0, %v429_v14 }
  0x98   : > { %3300 = vmatpush3.bf16.msra.mxu1 %v3689_v35  ;;  %v4918_v35 = vshll.u32 %v4135_v10, 16 }
  0x99   : > { %3301 = vmatprep.subr.bf16.mxu1 %v3698_v43 }
  0x9a   : > { %905 = vmatmul.mubr.bf16.gmra.mrb[40].mxu0 %v4265_v48  ;;  %1307 = vmatmul.mubr.bf16.gmra.mrb[40].mxu1 %v3982_v3  ;;  %v436_v38 = vor.u32 %v4918_v35, %v433_v24 }
  0x9b   : > { %912 = vmatprep.mubr.bf16.mxu0 %v4074_v30  ;;  %1314 = vmatprep.mubr.bf16.mxu1 %v3943_v25 }
  0x9c   : > { %3302 = vmatpush3.bf16.msra.mxu1 %v3698_v43  ;;  %v4320_v58 = vsel %vm3925_vm5, 0, %v436_v38  ;;  %v440_v43 = vrot.slane %v438_v63, 7  ;;  %v3710_v63 = vld [vmem:[%s4410_s6] sm:$0xff]  }
  0x9d   : > { %3303 = vmatprep.subr.bf16.mxu1 %v3699_v23  ;;  %3389 = vmatprep.subr.bf16.mxu0 %v3710_v63 }
  0x9e   : > { %v443_v20 = vor.u32 %v4919_v61, %v440_v43  ;;  %v3712_v61 = vld [vmem:[%s4410_s6 + $0x10] sm:$0xff]  }
  0xa0   : > { %3304 = vmatpush3.bf16.msra.mxu1 %v3699_v23  ;;  %v4332_v23 = vsel %vm3925_vm5, 0, %v443_v20 }
  0xa1   : > { %3305 = vmatprep.subr.bf16.mxu1 %v3700_v0 }
  0xa2   : > { %913 = vmatmul.mubr.bf16.gmra.mrb[44].mxu0 %v4279_v4  ;;  %1315 = vmatmul.mubr.bf16.gmra.mrb[44].mxu1 %v4034_v59 }
  0xa3   : > { %920 = vmatprep.mubr.bf16.mxu0 %v4098_v57  ;;  %1322 = vmatprep.mubr.bf16.mxu1 %v3945_v27 }
  0xa4   : > { %3306 = vmatpush3.bf16.msra.mxu1 %v3700_v0 }
  0xa5   : > { %3307 = vmatprep.subr.bf16.mxu1 %v3701_v56 }
  0xa8   : > { %3308 = vmatpush3.bf16.msra.mxu1 %v3701_v56 }
  0xa9   : > { %3341 = vmatprep.subr.bf16.mxu1 %v4291_v44 }
  0xaa   : > { %921 = vmatmul.mubr.bf16.gmra.mrb[48].mxu0 %v4295_v53  ;;  %1323 = vmatmul.mubr.bf16.gmra.mrb[48].mxu1 %v4072_v29 }
  0xab   : > { %928 = vmatprep.mubr.bf16.mxu0 %v4126_v21  ;;  %1330 = vmatprep.mubr.bf16.mxu1 %v3956_v42 }
  0xb2   : > { %929 = vmatmul.mubr.bf16.gmra.mrb[52].mxu0 %v4308_v8  ;;  %1331 = vmatmul.mubr.bf16.gmra.mrb[52].mxu1 %v4079_v33 }
  0xb3   : > { %936 = vmatprep.mubr.bf16.mxu0 %v4135_v10  ;;  %1338 = vmatprep.mubr.bf16.mxu1 %v3965_v52 }
  0xba   : > { %937 = vmatmul.mubr.bf16.gmra.mrb[56].mxu0 %v4320_v58  ;;  %1339 = vmatmul.mubr.bf16.gmra.mrb[56].mxu1 %v4145_v12 }
  0xbb   : > { %944 = vmatprep.mubr.bf16.mxu0 %v4150_v17  ;;  %1346 = vmatprep.mubr.bf16.mxu1 %v3985_v5 }
  0xc2   : > { %945 = vmatmul.mubr.bf16.gmra.mrb[60].mxu0 %v4332_v23  ;;  %1347 = vmatmul.mubr.bf16.gmra.mrb[60].mxu1 %v4198_v13 }
  0xc3   : > { %1354 = vmatprep.mubr.bf16.mxu1 %v4006_v26  ;;  %1807 = vmatprep.mubr.bf16.mxu0 %v3921_v62  ;;  %v3703_v62 = vld [vmem:[%s3890_s29 + $0x208] sm:$0xff]  }
  0xca   : > { %1355 = vmatmul.mubr.bf16.gmra.mrb[64].mxu1 %v4208_v40  ;;  %1808 = vmatmul.mubr.bf16.vlgmr.msra.gmra.mrb[64].mxu0 %v3982_v3 }
  0xcb   : > { %1362 = vmatprep.mubr.bf16.mxu1 %v4009_v31  ;;  %1815 = vmatprep.mubr.bf16.mxu0 %v3943_v25  ;;  %v3705_v25 = vld [vmem:[%s3890_s29 + $0x218] sm:$0xff]  }
  0xcc   : > { %3390 = vmatpush3.bf16.msra.mxu0 %v3710_v63 }
  0xcd   : > { %3391 = vmatprep.subr.bf16.mxu0 %v3711_v6 }
  0xd0   : > { %3392 = vmatpush3.bf16.msra.mxu0 %v3711_v6 }
  0xd1   : > { %3393 = vmatprep.subr.bf16.mxu0 %v3712_v61 }
  0xd2   : > { %1363 = vmatmul.mubr.bf16.gmra.mrb[68].mxu1 %v4236_v49  ;;  %1816 = vmatmul.mubr.bf16.gmra.mrb[68].mxu0 %v4034_v59 }
  0xd3   : > { %1370 = vmatprep.mubr.bf16.mxu1 %v4023_v46  ;;  %1823 = vmatprep.mubr.bf16.mxu0 %v3945_v27  ;;  %v3707_v27 = vld [vmem:[%s3890_s29 + $0x228] sm:$0xff]  }
  0xd4   : > { %3394 = vmatpush3.bf16.msra.mxu0 %v3712_v61 }
  0xda   : > { %1371 = vmatmul.mubr.bf16.gmra.mrb[72].mxu1 %v4251_v16  ;;  %1824 = vmatmul.mubr.bf16.gmra.mrb[72].mxu0 %v4072_v29 }
  0xdb   : > { %1378 = vmatprep.mubr.bf16.mxu1 %v4051_v7  ;;  %1831 = vmatprep.mubr.bf16.mxu0 %v3956_v42  ;;  %v3708_v42 = vld [vmem:[%s3890_s29 + $0x230] sm:$0xff]  }
  0xe2   : > { %1379 = vmatmul.mubr.bf16.gmra.mrb[76].mxu1 %v4265_v48  ;;  %1832 = vmatmul.mubr.bf16.gmra.mrb[76].mxu0 %v4079_v33 }
  0xe3   : > { %1386 = vmatprep.mubr.bf16.mxu1 %v4074_v30  ;;  %1839 = vmatprep.mubr.bf16.mxu0 %v3965_v52 }
  0xea   : > { %1387 = vmatmul.mubr.bf16.gmra.mrb[80].mxu1 %v4279_v4  ;;  %1840 = vmatmul.mubr.bf16.gmra.mrb[80].mxu0 %v4145_v12 }
  0xeb   : > { %1394 = vmatprep.mubr.bf16.mxu1 %v4098_v57  ;;  %1847 = vmatprep.mubr.bf16.mxu0 %v3985_v5 }
  0xf2   : > { %1395 = vmatmul.mubr.bf16.gmra.mrb[84].mxu1 %v4295_v53  ;;  %1848 = vmatmul.mubr.bf16.gmra.mrb[84].mxu0 %v4198_v13 }
  0xf3   : > { %1402 = vmatprep.mubr.bf16.mxu1 %v4126_v21  ;;  %1855 = vmatprep.mubr.bf16.mxu0 %v4006_v26 }
  0xfa   : > { %1403 = vmatmul.mubr.bf16.gmra.mrb[88].mxu1 %v4308_v8  ;;  %1856 = vmatmul.mubr.bf16.gmra.mrb[88].mxu0 %v4208_v40 }
  0xfb   : > { %1410 = vmatprep.mubr.bf16.mxu1 %v4135_v10  ;;  %1863 = vmatprep.mubr.bf16.mxu0 %v4009_v31 }
 0x102   : > { %1411 = vmatmul.mubr.bf16.gmra.mrb[92].mxu1 %v4320_v58  ;;  %1864 = vmatmul.mubr.bf16.gmra.mrb[92].mxu0 %v4236_v49 }
 0x103   : > { %3309 = vmatprep.mubr.bf16.mxu1 %v3790_v36  ;;  %1871 = vmatprep.mubr.bf16.mxu0 %v4023_v46  ;;  %v3709_v46 = vld [vmem:[%s3890_s29 + $0x238] sm:$0xff]  }
 0x10a   : > { %3310 = vmatmul.mubr.bf16.vlgmr.msra.gmra.mrb[0].mxu1 %v3913_v54  ;;  %1872 = vmatmul.mubr.bf16.gmra.mrb[96].mxu0 %v4251_v16  ;;  %v3706_v54 = vld [vmem:[%s3890_s29 + $0x220] sm:$0xff]  }
 0x10b   : > { %3342 = vmatpush3.bf16.msra.mxu1 %v4291_v44  ;;  %3313 = vmatprep.mubr.bf16.mxu1 %v3949_v34 }
 0x10c   : > { %1879 = vmatprep.mubr.bf16.mxu0 %v4051_v7  ;;  %3343 = vmatprep.subr.bf16.mxu1 %v3703_v62 }
 0x10f   : > { %3344 = vmatpush3.bf16.msra.mxu1 %v3703_v62 }
 0x110   : > { %3345 = vmatprep.subr.bf16.mxu1 %v3704_v1 }
 0x112   : > { %3314 = vmatmul.mubr.bf16.gmra.mrb[4].mxu1 %v3978_v2  ;;  %1880 = vmatmul.mubr.bf16.gmra.mrb[100].mxu0 %v4265_v48 }
 0x113   : > { %3317 = vmatprep.mubr.bf16.mxu1 %v3996_v18  ;;  %1887 = vmatprep.mubr.bf16.mxu0 %v4074_v30 }
 0x114   : > { %3346 = vmatpush3.bf16.msra.mxu1 %v3704_v1 }
 0x115   : > { %3347 = vmatprep.subr.bf16.mxu1 %v3705_v25 }
 0x118   : > { %3348 = vmatpush3.bf16.msra.mxu1 %v3705_v25 }
 0x119   : > { %3349 = vmatprep.subr.bf16.mxu1 %v3706_v54 }
 0x11a   : > { %3318 = vmatmul.mubr.bf16.gmra.mrb[8].mxu1 %v4002_v22  ;;  %1888 = vmatmul.mubr.bf16.gmra.mrb[104].mxu0 %v4279_v4 }
 0x11b   : > { %3321 = vmatprep.mubr.bf16.mxu1 %v4038_v60  ;;  %1895 = vmatprep.mubr.bf16.mxu0 %v4098_v57 }
 0x11c   : > { %3350 = vmatpush3.bf16.msra.mxu1 %v3706_v54 }
 0x11d   : > { %3351 = vmatprep.subr.bf16.mxu1 %v3707_v27  ;;  %v2829_v52 = vpop.f32.mrb[0].mxu0 }
 0x11e   : > { %v2830_v3 = vpop.f32.mrb[1].mxu0 }
 0x11f   : > { %v4389_v5 = vadd.f32 %v2830_v3, %v2829_v52  ;;  %v2832_v26 = vpop.f32.mrb[2].mxu0  ;;  %v3713_v3 = vld [vmem:[%s4410_s6 + $0x18] sm:$0xff]  }
 0x120   : > { %3352 = vmatpush3.bf16.msra.mxu1 %v3707_v27  ;;  %v2833_v31 = vpop.f32.mrb[3].mxu0  ;;  %3395 = vmatprep.subr.bf16.mxu0 %v3713_v3 }
 0x121   : > { %3353 = vmatprep.subr.bf16.mxu1 %v3708_v42  ;;  %v4392_v59 = vadd.f32 %v2833_v31, %v2832_v26  ;;  %3396 = vmatpush3.bf16.msra.mxu0 %v3713_v3 }
 0x122   : > { %3322 = vmatmul.mubr.bf16.gmra.mrb[12].mxu1 %v4045_v50  ;;  %1896 = vmatmul.mubr.bf16.gmra.mrb[108].mxu0 %v4295_v53 }
 0x123   : > { %3325 = vmatprep.mubr.bf16.mxu1 %v4088_v37  ;;  %1903 = vmatprep.mubr.bf16.mxu0 %v4126_v21 }
 0x124   : > { %3354 = vmatpush3.bf16.msra.mxu1 %v3708_v42 }
 0x125   : > { %3355 = vmatprep.subr.bf16.mxu1 %v3709_v46  ;;  %v2835_v7 = vpop.f32.mrb[4].mxu0 }
 0x126   : > { %v2836_v29 = vpop.f32.mrb[5].mxu0 }
 0x127   : > { %v4398_v30 = vadd.f32 %v2836_v29, %v2835_v7  ;;  %v2838_v33 = vpop.f32.mrb[6].mxu0 }
 0x128   : > { %3356 = vmatpush3.bf16.msra.mxu1 %v3709_v46  ;;  %v2839_v57 = vpop.f32.mrb[7].mxu0 }
 0x129   : > { %v4400_v12 = vadd.f32 %v2839_v57, %v2838_v33 }
 0x12a   : > { %3326 = vmatmul.mubr.bf16.gmra.mrb[16].mxu1 %v4094_v55  ;;  %1904 = vmatmul.mubr.bf16.gmra.mrb[112].mxu0 %v4308_v8 }
 0x12b   : > { %3329 = vmatprep.mubr.bf16.mxu1 %v4106_v11  ;;  %1911 = vmatprep.mubr.bf16.mxu0 %v4135_v10 }
 0x12d   : > { %v2841_v21 = vpop.f32.mrb[8].mxu0 }
 0x12e   : > { %v2842_v13 = vpop.f32.mrb[9].mxu0 }
 0x12f   : > { %v4413_v40 = vadd.f32 %v2842_v13, %v2841_v21  ;;  %v2844_v49 = vpop.f32.mrb[10].mxu0 }
 0x130   : > { %v2845_v16 = vpop.f32.mrb[11].mxu0 }
 0x131   : > { %v4415_v48 = vadd.f32 %v2845_v16, %v2844_v49 }
 0x132   : > { %3330 = vmatmul.mubr.bf16.gmra.mrb[20].mxu1 %v4133_v9  ;;  %1912 = vmatmul.mubr.bf16.gmra.mrb[116].mxu0 %v4320_v58 }
 0x133   : > { %3333 = vmatprep.mubr.bf16.mxu1 %v4164_v32  ;;  %1919 = vmatprep.mubr.bf16.mxu0 %v4150_v17 }
 0x135   : > { %v2847_v10 = vpop.f32.mrb[12].mxu0 }
 0x136   : > { %v2848_v15 = vpop.f32.mrb[13].mxu0 }
 0x137   : > { %v4421_v0 = vadd.f32 %v2848_v15, %v2847_v10  ;;  %v2850_v4 = vpop.f32.mrb[14].mxu0 }
 0x138   : > { %v2851_v51 = vpop.f32.mrb[15].mxu0 }
 0x139   : > { %v4423_v56 = vadd.f32 %v2851_v51, %v2850_v4 }
 0x13a   : > { %3334 = vmatmul.mubr.bf16.gmra.mrb[24].mxu1 %v4172_v41  ;;  %1920 = vmatmul.mubr.bf16.gmra.mrb[120].mxu0 %v4332_v23 }
 0x13b   : > { %3337 = vmatprep.mubr.bf16.mxu1 %v4204_v47  ;;  %1927 = vmatprep.mubr.bf16.mxu0 %v3790_v36 }
 0x13d   : > { %v2853_v44 = vpop.f32.mrb[16].mxu0 }
 0x13e   : > { %v2854_v17 = vpop.f32.mrb[17].mxu0 }
 0x13f   : > { %v4430_v53 = vadd.f32 %v2854_v17, %v2853_v44  ;;  %v2856_v45 = vpop.f32.mrb[18].mxu0 }
 0x140   : > { %v2857_v39 = vpop.f32.mrb[19].mxu0 }
 0x141   : > { %v4432_v14 = vadd.f32 %v2857_v39, %v2856_v45 }
 0x142   : > { %3338 = vmatmul.mubr.bf16.gmra.mrb[28].mxu1 %v4212_v28  ;;  %1928 = vmatmul.mubr.bf16.gmra.mrb[124].mxu0 %v3790_v36 }
 0x143   : > { %3357 = vmatprep.mubr.bf16.mxu1 %v3949_v34 }
 0x145   : > { %v2859_v8 = vpop.f32.mrb[20].mxu0 }
 0x146   : > { %v2860_v24 = vpop.f32.mrb[21].mxu0 }
 0x147   : > { %v4437_v35 = vadd.f32 %v2860_v24, %v2859_v8  ;;  %v2862_v38 = vpop.f32.mrb[22].mxu0 }
 0x148   : > { %v2863_v58 = vpop.f32.mrb[23].mxu0 }
 0x149   : > { %v4439_v43 = vadd.f32 %v2863_v58, %v2862_v38 }
 0x14a   : > { %3358 = vmatmul.mubr.bf16.vlgmr.msra.gmra.mrb[0].mxu1 %v3978_v2 }
 0x14b   : > { %3361 = vmatprep.mubr.bf16.mxu1 %v3996_v18 }
 0x14d   : > { %v2865_v20 = vpop.f32.mrb[24].mxu0 }
 0x14e   : > { %v2866_v23 = vpop.f32.mrb[25].mxu0 }
 0x14f   : > { %v4444_v62 = vadd.f32 %v2866_v23, %v2865_v20  ;;  %v2868_v34 = vpop.f32.mrb[26].mxu0 }
 0x150   : > { %v2869_v1 = vpop.f32.mrb[27].mxu0 }
 0x151   : > { %v4446_v25 = vadd.f32 %v2869_v1, %v2868_v34 }
 0x152   : > { %3362 = vmatmul.mubr.bf16.gmra.mrb[4].mxu1 %v4002_v22 }
 0x153   : > { %3365 = vmatprep.mubr.bf16.mxu1 %v4038_v60 }
 0x155   : > { %v2871_v54 = vpop.f32.mrb[28].mxu0 }
 0x156   : > { %v2872_v2 = vpop.f32.mrb[29].mxu0 }
 0x157   : > { %v4450_v27 = vadd.f32 %v2872_v2, %v2871_v54  ;;  %v2874_v18 = vpop.f32.mrb[30].mxu0 }
 0x158   : > { %v2875_v42 = vpop.f32.mrb[31].mxu0 }
 0x159   : > { %v4452_v52 = vadd.f32 %v2875_v42, %v2874_v18 }
 0x15a   : > { %3366 = vmatmul.mubr.bf16.gmra.mrb[8].mxu1 %v4045_v50 }
 0x15b   : > { %3369 = vmatprep.mubr.bf16.mxu1 %v4088_v37 }
 0x15d   : > { %v2965_v26 = vpop.f32.mrb[32].mxu1  ;;  %v2877_v31 = vpop.f32.mrb[32].mxu0 }
 0x15e   : > { %v2966_v46 = vpop.f32.mrb[33].mxu1  ;;  %v2878_v22 = vpop.f32.mrb[33].mxu0 }
 0x15f   : > { %v2967_v60 = vadd.f32 %v2966_v46, %v2965_v26  ;;  %v2968_v7 = vpop.f32.mrb[34].mxu1  ;;  %v4457_v29 = vadd.f32 %v2878_v22, %v2877_v31  ;;  %v2880_v33 = vpop.f32.mrb[34].mxu0 }
 0x160   : > { %v2969_v57 = vpop.f32.mrb[35].mxu1  ;;  %v2881_v21 = vpop.f32.mrb[35].mxu0 }
 0x161   : > { %v4460_v63 = vadd.f32 %v2967_v60, %v4389_v5  ;;  %v2970_v50 = vadd.f32 %v2969_v57, %v2968_v7  ;;  %v4462_v13 = vadd.f32 %v2881_v21, %v2880_v33 }
 0x162   : > { %3370 = vmatmul.mubr.bf16.gmra.mrb[12].mxu1 %v4094_v55 }
 0x163   : > { %v4466_v37 = vadd.f32 %v2970_v50, %v4392_v59  ;;  %3373 = vmatprep.mubr.bf16.mxu1 %v4106_v11  ;;  %v3714_v59 = vld [vmem:[%s4410_s6 + $0x20] sm:$0xff]  }
 0x164   : > { %3397 = vmatprep.subr.bf16.mxu0 %v3714_v59 }
 0x165   : > { %v2971_v49 = vpop.f32.mrb[36].mxu1  ;;  %v2883_v16 = vpop.f32.mrb[36].mxu0  ;;  %3398 = vmatpush3.bf16.msra.mxu0 %v3714_v59 }
 0x166   : > { %v2972_v10 = vpop.f32.mrb[37].mxu1  ;;  %v2884_v15 = vpop.f32.mrb[37].mxu0 }
 0x167   : > { %v2973_v4 = vadd.f32 %v2972_v10, %v2971_v49  ;;  %v2974_v51 = vpop.f32.mrb[38].mxu1  ;;  %v4469_v6 = vadd.f32 %v2884_v15, %v2883_v16  ;;  %v2886_v5 = vpop.f32.mrb[38].mxu0 }
 0x168   : > { %v2975_v44 = vpop.f32.mrb[39].mxu1  ;;  %v2887_v17 = vpop.f32.mrb[39].mxu0 }
 0x169   : > { %v4472_v45 = vadd.f32 %v2973_v4, %v4398_v30  ;;  %v2976_v55 = vadd.f32 %v2975_v44, %v2974_v51  ;;  %v4474_v39 = vadd.f32 %v2887_v17, %v2886_v5 }
 0x16a   : > { %3374 = vmatmul.mubr.bf16.gmra.mrb[16].mxu1 %v4133_v9 }
 0x16b   : > { %v4479_v11 = vadd.f32 %v2976_v55, %v4400_v12  ;;  %3377 = vmatprep.mubr.bf16.mxu1 %v4164_v32 }
 0x16d   : > { %v2977_v8 = vpop.f32.mrb[40].mxu1  ;;  %v2889_v24 = vpop.f32.mrb[40].mxu0 }
 0x16e   : > { %v2978_v38 = vpop.f32.mrb[41].mxu1  ;;  %v2890_v58 = vpop.f32.mrb[41].mxu0 }
 0x16f   : > { %v2979_v61 = vadd.f32 %v2978_v38, %v2977_v8  ;;  %v2980_v30 = vpop.f32.mrb[42].mxu1  ;;  %v4482_v20 = vadd.f32 %v2890_v58, %v2889_v24  ;;  %v2892_v23 = vpop.f32.mrb[42].mxu0 }
 0x170   : > { %v2981_v34 = vpop.f32.mrb[43].mxu1  ;;  %v2893_v1 = vpop.f32.mrb[43].mxu0 }
 0x171   : > { %v4485_v9 = vadd.f32 %v2979_v61, %v4413_v40  ;;  %v2982_v12 = vadd.f32 %v2981_v34, %v2980_v30  ;;  %v4487_v54 = vadd.f32 %v2893_v1, %v2892_v23 }
 0x172   : > { %3378 = vmatmul.mubr.bf16.gmra.mrb[20].mxu1 %v4172_v41 }
 0x173   : > { %v4491_v32 = vadd.f32 %v2982_v12, %v4415_v48  ;;  %3381 = vmatprep.mubr.bf16.mxu1 %v4204_v47  ;;  %v3715_v48 = vld [vmem:[%s4410_s6 + $0x28] sm:$0xff]  }
 0x174   : > { %3399 = vmatprep.subr.bf16.mxu0 %v3715_v48 }
 0x175   : > { %v2983_v2 = vpop.f32.mrb[44].mxu1  ;;  %v2895_v18 = vpop.f32.mrb[44].mxu0  ;;  %3400 = vmatpush3.bf16.msra.mxu0 %v3715_v48 }
 0x176   : > { %v2984_v42 = vpop.f32.mrb[45].mxu1  ;;  %v2896_v3 = vpop.f32.mrb[45].mxu0 }
 0x177   : > { %v2985_v26 = vadd.f32 %v2984_v42, %v2983_v2  ;;  %v2986_v31 = vpop.f32.mrb[46].mxu1  ;;  %v4494_v46 = vadd.f32 %v2896_v3, %v2895_v18  ;;  %v2898_v40 = vpop.f32.mrb[46].mxu0 }
 0x178   : > { %v2987_v22 = vpop.f32.mrb[47].mxu1  ;;  %v2899_v60 = vpop.f32.mrb[47].mxu0 }
 0x179   : > { %v4497_v7 = vadd.f32 %v2985_v26, %v4421_v0  ;;  %v2988_v41 = vadd.f32 %v2987_v22, %v2986_v31  ;;  %v4499_v33 = vadd.f32 %v2899_v60, %v2898_v40 }
 0x17a   : > { %3382 = vmatmul.mubr.bf16.gmra.mrb[24].mxu1 %v4212_v28 }
 0x17b   : > { %v4504_v47 = vadd.f32 %v2988_v41, %v4423_v56  ;;  %3385 = vmatprep.mubr.bf16.mxu1 %v4222_v19 }
 0x17d   : > { %v2989_v57 = vpop.f32.mrb[48].mxu1  ;;  %v2901_v21 = vpop.f32.mrb[48].mxu0 }
 0x17e   : > { %v2990_v50 = vpop.f32.mrb[49].mxu1  ;;  %v2902_v49 = vpop.f32.mrb[49].mxu0 }
 0x17f   : > { %v2991_v16 = vadd.f32 %v2990_v50, %v2989_v57  ;;  %v2992_v0 = vpop.f32.mrb[50].mxu1  ;;  %v4507_v10 = vadd.f32 %v2902_v49, %v2901_v21  ;;  %v2904_v15 = vpop.f32.mrb[50].mxu0 }
 0x180   : > { %v2993_v4 = vpop.f32.mrb[51].mxu1  ;;  %v2905_v51 = vpop.f32.mrb[51].mxu0 }
 0x181   : > { %v4510_v28 = vadd.f32 %v2991_v16, %v4430_v53  ;;  %v2994_v56 = vadd.f32 %v2993_v4, %v2992_v0  ;;  %v4512_v5 = vadd.f32 %v2905_v51, %v2904_v15 }
 0x182   : > { %3386 = vmatmul.mubr.bf16.gmra.mrb[28].mxu1 %v3790_v36  ;;  %v3716_v36 = vld [vmem:[%s4410_s6 + $0x30] sm:$0xff]  }
 0x183   : > { %v4516_v19 = vadd.f32 %v2994_v56, %v4432_v14  ;;  %3401 = vmatprep.subr.bf16.mxu0 %v3716_v36 }
 0x184   : > { %3402 = vmatpush3.bf16.msra.mxu0 %v3716_v36 }
 0x185   : > { %v2995_v44 = vpop.f32.mrb[52].mxu1  ;;  %v2907_v17 = vpop.f32.mrb[52].mxu0 }
 0x186   : > { %v2996_v55 = vpop.f32.mrb[53].mxu1  ;;  %v2908_v59 = vpop.f32.mrb[53].mxu0 }
 0x187   : > { %v2997_v8 = vadd.f32 %v2996_v55, %v2995_v44  ;;  %v2998_v24 = vpop.f32.mrb[54].mxu1  ;;  %v4518_v38 = vadd.f32 %v2908_v59, %v2907_v17  ;;  %v2910_v58 = vpop.f32.mrb[54].mxu0  ;;  %v3717_v17 = vld [vmem:[%s4410_s6 + $0x38] sm:$0xff]  }
 0x188   : > { %v2999_v53 = vpop.f32.mrb[55].mxu1  ;;  %v2911_v61 = vpop.f32.mrb[55].mxu0  ;;  %3403 = vmatprep.subr.bf16.mxu0 %v3717_v17 }
 0x189   : > { %v4521_v30 = vadd.f32 %v2997_v8, %v4437_v35  ;;  %v3000_v23 = vadd.f32 %v2999_v53, %v2998_v24  ;;  %v4523_v34 = vadd.f32 %v2911_v61, %v2910_v58  ;;  %3404 = vmatpush3.bf16.msra.mxu0 %v3717_v17 }
 0x18b   : > { %v4527_v14 = vadd.f32 %v3000_v23, %v4439_v43 }
 0x18d   : > { %v3001_v1 = vpop.f32.mrb[56].mxu1  ;;  %v2913_v12 = vpop.f32.mrb[56].mxu0 }
 0x18e   : > { %v3002_v2 = vpop.f32.mrb[57].mxu1  ;;  %v2914_v18 = vpop.f32.mrb[57].mxu0 }
 0x18f   : > { %v3003_v42 = vadd.f32 %v3002_v2, %v3001_v1  ;;  %v3004_v3 = vpop.f32.mrb[58].mxu1  ;;  %v4529_v26 = vadd.f32 %v2914_v18, %v2913_v12  ;;  %v2916_v31 = vpop.f32.mrb[58].mxu0 }
 0x190   : > { %v3005_v35 = vpop.f32.mrb[59].mxu1  ;;  %v2917_v40 = vpop.f32.mrb[59].mxu0 }
 0x191   : > { %v4532_v22 = vadd.f32 %v3003_v42, %v4444_v62  ;;  %v3006_v60 = vadd.f32 %v3005_v35, %v3004_v3  ;;  %v4534_v43 = vadd.f32 %v2917_v40, %v2916_v31 }
 0x193   : > { %v4537_v41 = vadd.f32 %v3006_v60, %v4446_v25 }
 0x195   : > { %v3007_v48 = vpop.f32.mrb[60].mxu1  ;;  %v2919_v57 = vpop.f32.mrb[60].mxu0 }
 0x196   : > { %v3008_v21 = vpop.f32.mrb[61].mxu1  ;;  %v2920_v50 = vpop.f32.mrb[61].mxu0 }
 0x197   : > { %v3009_v49 = vadd.f32 %v3008_v21, %v3007_v48  ;;  %v3010_v16 = vpop.f32.mrb[62].mxu1  ;;  %v4539_v0 = vadd.f32 %v2920_v50, %v2919_v57  ;;  %v2922_v15 = vpop.f32.mrb[62].mxu0 }
 0x198   : > { %v3011_v4 = vpop.f32.mrb[63].mxu1  ;;  %v2923_v51 = vpop.f32.mrb[63].mxu0 }
 0x199   : > { %v4542_v62 = vadd.f32 %v3009_v49, %v4450_v27  ;;  %v3012_v56 = vadd.f32 %v3011_v4, %v3010_v16  ;;  %v4544_v44 = vadd.f32 %v2923_v51, %v2922_v15 }
 0x19b   : > { %v4548_v25 = vadd.f32 %v3012_v56, %v4452_v52 }
 0x19d   : > { %v3013_v55 = vpop.f32.mrb[64].mxu1  ;;  %v3101_v59 = vpop.f32.mrb[64].mxu0 }
 0x19e   : > { %v3014_v8 = vpop.f32.mrb[65].mxu1  ;;  %v3102_v24 = vpop.f32.mrb[65].mxu0 }
 0x19f   : > { %v3015_v58 = vadd.f32 %v3014_v8, %v3013_v55  ;;  %v3103_v53 = vadd.f32 %v3102_v24, %v3101_v59  ;;  %v3016_v61 = vpop.f32.mrb[66].mxu1  ;;  %v3104_v23 = vpop.f32.mrb[66].mxu0 }
 0x1a0   : > { %v3017_v36 = vpop.f32.mrb[67].mxu1  ;;  %v3105_v27 = vpop.f32.mrb[67].mxu0 }
 0x1a1   : > { %v4551_v1 = vadd.f32 %v3015_v58, %v4457_v29  ;;  %v3018_v12 = vadd.f32 %v3017_v36, %v3016_v61  ;;  %v3106_v2 = vadd.f32 %v3105_v27, %v3104_v23  ;;  %v4554_v52 = vadd.f32 %v4460_v63, %v3103_v53 }
 0x1a3   : > { %v4557_v18 = vadd.f32 %v3018_v12, %v4462_v13  ;;  %v4560_v42 = vadd.f32 %v4466_v37, %v3106_v2 }
 0x1a5   : > { %v3019_v3 = vpop.f32.mrb[68].mxu1  ;;  %v3107_v31 = vpop.f32.mrb[68].mxu0 }
 0x1a6   : > { %v3020_v35 = vpop.f32.mrb[69].mxu1  ;;  %v3108_v40 = vpop.f32.mrb[69].mxu0 }
 0x1a7   : > { %v3021_v60 = vadd.f32 %v3020_v35, %v3019_v3  ;;  %v3109_v48 = vadd.f32 %v3108_v40, %v3107_v31  ;;  %v3022_v57 = vpop.f32.mrb[70].mxu1  ;;  %v3110_v29 = vpop.f32.mrb[70].mxu0 }
 0x1a8   : > { %v3023_v21 = vpop.f32.mrb[71].mxu1  ;;  %v3111_v50 = vpop.f32.mrb[71].mxu0 }
 0x1a9   : > { %v4563_v49 = vadd.f32 %v3021_v60, %v4469_v6  ;;  %v3024_v63 = vadd.f32 %v3023_v21, %v3022_v57  ;;  %v3112_v16 = vadd.f32 %v3111_v50, %v3110_v29  ;;  %v4566_v13 = vadd.f32 %v4472_v45, %v3109_v48 }
 0x1ab   : > { %v4569_v37 = vadd.f32 %v3024_v63, %v4474_v39  ;;  %v4572_v15 = vadd.f32 %v4479_v11, %v3112_v16 }
 0x1ad   : > { %v3025_v4 = vpop.f32.mrb[72].mxu1  ;;  %v3113_v51 = vpop.f32.mrb[72].mxu0 }
 0x1ae   : > { %v3026_v56 = vpop.f32.mrb[73].mxu1  ;;  %v3114_v17 = vpop.f32.mrb[73].mxu0 }
 0x1af   : > { %v3027_v55 = vadd.f32 %v3026_v56, %v3025_v4  ;;  %v3115_v59 = vadd.f32 %v3114_v17, %v3113_v51  ;;  %v3028_v8 = vpop.f32.mrb[74].mxu1  ;;  %v3116_v6 = vpop.f32.mrb[74].mxu0 }
 0x1b0   : > { %v3029_v24 = vpop.f32.mrb[75].mxu1  ;;  %v3117_v58 = vpop.f32.mrb[75].mxu0 }
 0x1b1   : > { %v4575_v53 = vadd.f32 %v3027_v55, %v4482_v20  ;;  %v3030_v45 = vadd.f32 %v3029_v24, %v3028_v8  ;;  %v3118_v61 = vadd.f32 %v3117_v58, %v3116_v6  ;;  %v4578_v39 = vadd.f32 %v4485_v9, %v3115_v59 }
 0x1b3   : > { %v4581_v11 = vadd.f32 %v3030_v45, %v4487_v54  ;;  %v4584_v23 = vadd.f32 %v4491_v32, %v3118_v61 }
 0x1b5   : > { %v3031_v36 = vpop.f32.mrb[76].mxu1  ;;  %v3119_v27 = vpop.f32.mrb[76].mxu0 }
 0x1b6   : > { %v3032_v12 = vpop.f32.mrb[77].mxu1  ;;  %v3120_v2 = vpop.f32.mrb[77].mxu0 }
 0x1b7   : > { %v3033_v3 = vadd.f32 %v3032_v12, %v3031_v36  ;;  %v3121_v31 = vadd.f32 %v3120_v2, %v3119_v27  ;;  %v3034_v35 = vpop.f32.mrb[78].mxu1  ;;  %v3122_v20 = vpop.f32.mrb[78].mxu0 }
 0x1b8   : > { %v3035_v40 = vpop.f32.mrb[79].mxu1  ;;  %v3123_v60 = vpop.f32.mrb[79].mxu0 }
 0x1b9   : > { %v4587_v48 = vadd.f32 %v3033_v3, %v4494_v46  ;;  %v3036_v9 = vadd.f32 %v3035_v40, %v3034_v35  ;;  %v3124_v57 = vadd.f32 %v3123_v60, %v3122_v20  ;;  %v4590_v54 = vadd.f32 %v4497_v7, %v3121_v31 }
 0x1bb   : > { %v4593_v32 = vadd.f32 %v3036_v9, %v4499_v33  ;;  %v4596_v29 = vadd.f32 %v4504_v47, %v3124_v57 }
 0x1bd   : > { %v3037_v21 = vpop.f32.mrb[80].mxu1  ;;  %v3125_v50 = vpop.f32.mrb[80].mxu0 }
 0x1be   : > { %v3038_v63 = vpop.f32.mrb[81].mxu1  ;;  %v3126_v16 = vpop.f32.mrb[81].mxu0 }
 0x1bf   : > { %v3039_v4 = vadd.f32 %v3038_v63, %v3037_v21  ;;  %v3127_v51 = vadd.f32 %v3126_v16, %v3125_v50  ;;  %v3040_v56 = vpop.f32.mrb[82].mxu1  ;;  %v3128_v46 = vpop.f32.mrb[82].mxu0 }
 0x1c0   : > { %v3041_v17 = vpop.f32.mrb[83].mxu1  ;;  %v3129_v55 = vpop.f32.mrb[83].mxu0 }
 0x1c1   : > { %v4599_v59 = vadd.f32 %v3039_v4, %v4507_v10  ;;  %v3042_v7 = vadd.f32 %v3041_v17, %v3040_v56  ;;  %v3130_v8 = vadd.f32 %v3129_v55, %v3128_v46  ;;  %v4602_v33 = vadd.f32 %v4510_v28, %v3127_v51 }
 0x1c3   : > { %v4605_v47 = vadd.f32 %v3042_v7, %v4512_v5  ;;  %v4608_v6 = vadd.f32 %v4516_v19, %v3130_v8 }
 0x1c5   : > { %v3043_v24 = vpop.f32.mrb[84].mxu1  ;;  %v3131_v58 = vpop.f32.mrb[84].mxu0 }
 0x1c6   : > { %v3044_v45 = vpop.f32.mrb[85].mxu1  ;;  %v3132_v61 = vpop.f32.mrb[85].mxu0 }
 0x1c7   : > { %v3045_v36 = vadd.f32 %v3044_v45, %v3043_v24  ;;  %v3133_v27 = vadd.f32 %v3132_v61, %v3131_v58  ;;  %v3046_v12 = vpop.f32.mrb[86].mxu1  ;;  %v3134_v10 = vpop.f32.mrb[86].mxu0 }
 0x1c8   : > { %v3047_v2 = vpop.f32.mrb[87].mxu1  ;;  %v3135_v3 = vpop.f32.mrb[87].mxu0 }
 0x1c9   : > { %v4611_v31 = vadd.f32 %v3045_v36, %v4518_v38  ;;  %v3048_v28 = vadd.f32 %v3047_v2, %v3046_v12  ;;  %v3136_v35 = vadd.f32 %v3135_v3, %v3134_v10  ;;  %v4614_v5 = vadd.f32 %v4521_v30, %v3133_v27 }
 0x1cb   : > { %v4617_v19 = vadd.f32 %v3048_v28, %v4523_v34  ;;  %v4620_v20 = vadd.f32 %v4527_v14, %v3136_v35 }
 0x1cd   : > { %v3049_v40 = vpop.f32.mrb[88].mxu1  ;;  %v3137_v60 = vpop.f32.mrb[88].mxu0 }
 0x1ce   : > { %v3050_v9 = vpop.f32.mrb[89].mxu1  ;;  %v3138_v57 = vpop.f32.mrb[89].mxu0 }
 0x1cf   : > { %v3051_v21 = vadd.f32 %v3050_v9, %v3049_v40  ;;  %v3139_v50 = vadd.f32 %v3138_v57, %v3137_v60  ;;  %v3052_v63 = vpop.f32.mrb[90].mxu1  ;;  %v3140_v38 = vpop.f32.mrb[90].mxu0 }
 0x1d0   : > { %v3053_v16 = vpop.f32.mrb[91].mxu1  ;;  %v3141_v4 = vpop.f32.mrb[91].mxu0 }
 0x1d1   : > { %v4623_v51 = vadd.f32 %v3051_v21, %v4529_v26  ;;  %v3054_v30 = vadd.f32 %v3053_v16, %v3052_v63  ;;  %v3142_v56 = vadd.f32 %v3141_v4, %v3140_v38  ;;  %v4626_v34 = vadd.f32 %v4532_v22, %v3139_v50 }
 0x1d3   : > { %v4629_v14 = vadd.f32 %v3054_v30, %v4534_v43  ;;  %v4632_v46 = vadd.f32 %v4537_v41, %v3142_v56 }
 0x1d5   : > { %v3055_v17 = vpop.f32.mrb[92].mxu1  ;;  %v3143_v55 = vpop.f32.mrb[92].mxu0 }
 0x1d6   : > { %v3056_v7 = vpop.f32.mrb[93].mxu1  ;;  %v3144_v8 = vpop.f32.mrb[93].mxu0 }
 0x1d7   : > { %v3057_v24 = vadd.f32 %v3056_v7, %v3055_v17  ;;  %v3145_v58 = vadd.f32 %v3144_v8, %v3143_v55  ;;  %v3058_v45 = vpop.f32.mrb[94].mxu1  ;;  %v3146_v26 = vpop.f32.mrb[94].mxu0 }
 0x1d8   : > { %v3059_v61 = vpop.f32.mrb[95].mxu1  ;;  %v3147_v36 = vpop.f32.mrb[95].mxu0 }
 0x1d9   : > { %v4635_v27 = vadd.f32 %v3057_v24, %v4539_v0  ;;  %v3060_v22 = vadd.f32 %v3059_v61, %v3058_v45  ;;  %v3148_v12 = vadd.f32 %v3147_v36, %v3146_v26  ;;  %v4638_v43 = vadd.f32 %v4542_v62, %v3145_v58 }
 0x1db   : > { %v4641_v41 = vadd.f32 %v3060_v22, %v4544_v44  ;;  %v4644_v10 = vadd.f32 %v4548_v25, %v3148_v12 }
 0x1dd   : > { %v3149_v2 = vpop.f32.mrb[96].mxu0 }
 0x1de   : > { %v3150_v3 = vpop.f32.mrb[97].mxu0 }
 0x1df   : > { %v3151_v28 = vadd.f32 %v3150_v3, %v3149_v2  ;;  %v3152_v35 = vpop.f32.mrb[98].mxu0 }
 0x1e0   : > { %v3153_v40 = vpop.f32.mrb[99].mxu0 }
 0x1e1   : > { %v3154_v60 = vadd.f32 %v3153_v40, %v3152_v35  ;;  %v4647_v0 = vadd.f32 %v4551_v1, %v3151_v28 }
 0x1e3   : > { %v4650_v9 = vadd.f32 %v4557_v18, %v3154_v60 }
 0x1e5   : > { %v3155_v62 = vpop.f32.mrb[100].mxu0 }
 0x1e6   : > { %v3156_v57 = vpop.f32.mrb[101].mxu0 }
 0x1e7   : > { %v3157_v21 = vadd.f32 %v3156_v57, %v3155_v62  ;;  %v3158_v44 = vpop.f32.mrb[102].mxu0 }
 0x1e8   : > { %v3159_v50 = vpop.f32.mrb[103].mxu0 }
 0x1e9   : > { %v3160_v63 = vadd.f32 %v3159_v50, %v3158_v44  ;;  %v4653_v25 = vadd.f32 %v4563_v49, %v3157_v21 }
 0x1eb   : > { %v4656_v38 = vadd.f32 %v4569_v37, %v3160_v63 }
 0x1ed   : > { %v3161_v16 = vpop.f32.mrb[104].mxu0 }
 0x1ee   : > { %v3162_v4 = vpop.f32.mrb[105].mxu0 }
 0x1ef   : > { %v3163_v30 = vadd.f32 %v3162_v4, %v3161_v16  ;;  %v3164_v1 = vpop.f32.mrb[106].mxu0 }
 0x1f0   : > { %v3165_v56 = vpop.f32.mrb[107].mxu0 }
 0x1f1   : > { %v3166_v17 = vadd.f32 %v3165_v56, %v3164_v1  ;;  %v4659_v18 = vadd.f32 %v4575_v53, %v3163_v30 }
 0x1f3   : > { %v4662_v55 = vadd.f32 %v4581_v11, %v3166_v17 }
 0x1f5   : > { %v3167_v7 = vpop.f32.mrb[108].mxu0 }
 0x1f6   : > { %v3168_v8 = vpop.f32.mrb[109].mxu0 }
 0x1f7   : > { %v3169_v24 = vadd.f32 %v3168_v8, %v3167_v7  ;;  %v3170_v49 = vpop.f32.mrb[110].mxu0 }
 0x1f8   : > { %v3171_v58 = vpop.f32.mrb[111].mxu0 }
 0x1f9   : > { %v3172_v45 = vadd.f32 %v3171_v58, %v3170_v49  ;;  %v4665_v37 = vadd.f32 %v4587_v48, %v3169_v24 }
 0x1fb   : > { %v4668_v26 = vadd.f32 %v4593_v32, %v3172_v45 }
 0x1fd   : > { %v3173_v61 = vpop.f32.mrb[112].mxu0 }
 0x1fe   : > { %v3174_v36 = vpop.f32.mrb[113].mxu0 }
 0x1ff   : > { %v3175_v22 = vadd.f32 %v3174_v36, %v3173_v61  ;;  %v3176_v53 = vpop.f32.mrb[114].mxu0 }
 0x200   : > { %v3177_v12 = vpop.f32.mrb[115].mxu0 }
 0x201   : > { %v3178_v2 = vadd.f32 %v3177_v12, %v3176_v53  ;;  %v4671_v11 = vadd.f32 %v4599_v59, %v3175_v22 }
 0x203   : > { %v4674_v3 = vadd.f32 %v4605_v47, %v3178_v2 }
 0x205   : > { %v3179_v28 = vpop.f32.mrb[116].mxu0 }
 0x206   : > { %v3180_v35 = vpop.f32.mrb[117].mxu0 }
 0x207   : > { %v3181_v40 = vadd.f32 %v3180_v35, %v3179_v28  ;;  %v3182_v48 = vpop.f32.mrb[118].mxu0 }
 0x208   : > { %v3183_v60 = vpop.f32.mrb[119].mxu0 }
 0x209   : > { %v3184_v62 = vadd.f32 %v3183_v60, %v3182_v48  ;;  %v4677_v32 = vadd.f32 %v4611_v31, %v3181_v40 }
 0x20b   : > { %v4680_v57 = vadd.f32 %v4617_v19, %v3184_v62 }
 0x20d   : > { %v3185_v21 = vpop.f32.mrb[120].mxu0 }
 0x20e   : > { %v3186_v44 = vpop.f32.mrb[121].mxu0 }
 0x20f   : > { %v3187_v50 = vadd.f32 %v3186_v44, %v3185_v21  ;;  %v3188_v59 = vpop.f32.mrb[122].mxu0 }
 0x210   : > { %v3189_v63 = vpop.f32.mrb[123].mxu0 }
 0x211   : > { %v3190_v16 = vadd.f32 %v3189_v63, %v3188_v59  ;;  %v4683_v47 = vadd.f32 %v4623_v51, %v3187_v50 }
 0x213   : > { %v4686_v4 = vadd.f32 %v4629_v14, %v3190_v16 }
 0x215   : > { %v3191_v30 = vpop.f32.mrb[124].mxu0 }
 0x216   : > { %v3192_v1 = vpop.f32.mrb[125].mxu0 }
 0x217   : > { %v3193_v56 = vadd.f32 %v3192_v1, %v3191_v30  ;;  %v3194_v31 = vpop.f32.mrb[126].mxu0 }
 0x218   : > { %v3195_v17 = vpop.f32.mrb[127].mxu0 }
 0x219   : > { %v3196_v7 = vadd.f32 %v3195_v17, %v3194_v31  ;;  %v4689_v19 = vadd.f32 %v4635_v27, %v3193_v56 }
 0x21b   : > { %v4692_v8 = vadd.f32 %v4641_v41, %v3196_v7 }
 0x21d   : > { %v3359_v24 = vpop.f32.mrb[0].mxu1 }
 0x21e   : > { %v3439_v49 = vadd.f32 %v4566_v13, %v3359_v24  ;;  %v1970_v51 = vpop.f32.mrb[1].mxu1 }
 0x21f   : > { %v3442_v58 = vadd.f32 %v4554_v52, %v1970_v51  ;;  %v3360_v14 = vpop.f32.mrb[2].mxu1 }
 0x220   : > { %v3445_v45 = vadd.f32 %v4572_v15, %v3360_v14  ;;  %v1973_v61 = vpop.f32.mrb[3].mxu1  ;;  %v2131_v22 = vmax.f32 %v3439_v49, 0.0 }
 0x221   : > { %v3448_v36 = vadd.f32 %v4560_v42, %v1973_v61  ;;  %v2129_v12 = vmax.f32 %v3442_v58, 0.0 }
 0x222   : > { %v2132_v53 = vmax.f32 %v3445_v45, 0.0 }
 0x223   : > { %v2130_v27 = vmax.f32 %v3448_v36, 0.0 }
 0x224   : > { %v2162_v2 = vpack.c.bf16 %v2132_v53, %v2131_v22 }
 0x225   : > { %v2161_v28 = vpack.c.bf16 %v2130_v27, %v2129_v12  ;;  %v3363_v41 = vpop.f32.mrb[4].mxu1 }
 0x226   : > { %v3451_v35 = vadd.f32 %v4590_v54, %v3363_v41  ;;  %v1986_v40 = vpop.f32.mrb[5].mxu1 }
 0x227   : > { %v3454_v13 = vadd.f32 %v4578_v39, %v1986_v40  ;;  %v3364_v48 = vpop.f32.mrb[6].mxu1  ;;  %3405 = vmatprep.mubr.bf16.mxu0 %v2161_v28 }
 0x228   : > { %v3457_v52 = vadd.f32 %v4596_v29, %v3364_v48  ;;  %v1989_v15 = vpop.f32.mrb[7].mxu1  ;;  %3406 = vmatmul.mubr.bf16.vlgmr.msra.gmra.mrb[128].mxu0 %v2162_v2  ;;  %v2135_v60 = vmax.f32 %v3451_v35, 0.0 }
 0x229   : > { %v3460_v42 = vadd.f32 %v4584_v23, %v1989_v15  ;;  %v2133_v21 = vmax.f32 %v3454_v13, 0.0 }
 0x22a   : > { %v2136_v62 = vmax.f32 %v3457_v52, 0.0 }
 0x22b   : > { %v2134_v44 = vmax.f32 %v3460_v42, 0.0 }
 0x22c   : > { %v2164_v50 = vpack.c.bf16 %v2136_v62, %v2135_v60 }
 0x22d   : > { %v2163_v59 = vpack.c.bf16 %v2134_v44, %v2133_v21  ;;  %v3367_v63 = vpop.f32.mrb[8].mxu1 }
 0x22e   : > { %v3463_v54 = vadd.f32 %v4614_v5, %v3367_v63  ;;  %v2002_v16 = vpop.f32.mrb[9].mxu1 }
 0x22f   : > { %v3466_v39 = vadd.f32 %v4602_v33, %v2002_v16  ;;  %v3368_v30 = vpop.f32.mrb[10].mxu1  ;;  %3409 = vmatprep.mubr.bf16.mxu0 %v2163_v59 }
 0x230   : > { %v3469_v29 = vadd.f32 %v4620_v20, %v3368_v30  ;;  %v2005_v1 = vpop.f32.mrb[11].mxu1  ;;  %3410 = vmatmul.mubr.bf16.gmra.mrb[132].mxu0 %v2164_v50  ;;  %v2139_v56 = vmax.f32 %v3463_v54, 0.0 }
 0x231   : > { %v3472_v23 = vadd.f32 %v4608_v6, %v2005_v1  ;;  %v2137_v17 = vmax.f32 %v3466_v39, 0.0 }
 0x232   : > { %v2140_v31 = vmax.f32 %v3469_v29, 0.0 }
 0x233   : > { %v2138_v7 = vmax.f32 %v3472_v23, 0.0 }
 0x234   : > { %v2166_v24 = vpack.c.bf16 %v2140_v31, %v2139_v56 }
 0x235   : > { %v2165_v49 = vpack.c.bf16 %v2138_v7, %v2137_v17  ;;  %v3371_v51 = vpop.f32.mrb[12].mxu1 }
 0x236   : > { %v3475_v5 = vadd.f32 %v4638_v43, %v3371_v51  ;;  %v2018_v58 = vpop.f32.mrb[13].mxu1 }
 0x237   : > { %v3478_v33 = vadd.f32 %v4626_v34, %v2018_v58  ;;  %v3372_v14 = vpop.f32.mrb[14].mxu1  ;;  %3413 = vmatprep.mubr.bf16.mxu0 %v2165_v49 }
 0x238   : > { %v3481_v20 = vadd.f32 %v4644_v10, %v3372_v14  ;;  %v2021_v45 = vpop.f32.mrb[15].mxu1  ;;  %3414 = vmatmul.mubr.bf16.gmra.mrb[136].mxu0 %v2166_v24  ;;  %v2143_v61 = vmax.f32 %v3475_v5, 0.0 }
 0x239   : > { %v3484_v6 = vadd.f32 %v4632_v46, %v2021_v45  ;;  %v2141_v22 = vmax.f32 %v3478_v33, 0.0 }
 0x23a   : > { %v2144_v36 = vmax.f32 %v3481_v20, 0.0 }
 0x23b   : > { %v2142_v53 = vmax.f32 %v3484_v6, 0.0 }
 0x23c   : > { %v2168_v12 = vpack.c.bf16 %v2144_v36, %v2143_v61 }
 0x23d   : > { %v2167_v27 = vpack.c.bf16 %v2142_v53, %v2141_v22  ;;  %v3375_v2 = vpop.f32.mrb[16].mxu1  ;;  %v3718_v22 = vld [vmem:[#allocation2 + $0x10] sm:$0xff] }
 0x23e   : > { %v3487_v43 = vadd.f32 %v4653_v25, %v3375_v2  ;;  %v2034_v28 = vpop.f32.mrb[17].mxu1 }
 0x23f   : > { %v3490_v34 = vadd.f32 %v4647_v0, %v2034_v28  ;;  %v3376_v41 = vpop.f32.mrb[18].mxu1  ;;  %3417 = vmatprep.mubr.bf16.mxu0 %v2167_v27  ;;  %v3721_v28 = vld [vmem:[#allocation2 + $0x8] sm:$0xff] }
 0x240   : > { %v3493_v10 = vadd.f32 %v4656_v38, %v3376_v41  ;;  %v2037_v35 = vpop.f32.mrb[19].mxu1  ;;  %3418 = vmatmul.mubr.bf16.gmra.mrb[140].mxu0 %v2168_v12  ;;  %v2147_v40 = vmax.f32 %v3487_v43, 0.0  ;;  %v3719_v12 = vld [vmem:[#allocation2] sm:$0xff] }
 0x241   : > { %v3496_v46 = vadd.f32 %v4650_v9, %v2037_v35  ;;  %v2145_v48 = vmax.f32 %v3490_v34, 0.0 }
 0x242   : > { %v2148_v13 = vmax.f32 %v3493_v10, 0.0  ;;  %v3722_v10 = vld [vmem:[#allocation2 + $0x30] sm:$0xff] }
 0x243   : > { %v2146_v52 = vmax.f32 %v3496_v46, 0.0 }
 0x244   : > { %v2170_v15 = vpack.c.bf16 %v2148_v13, %v2147_v40  ;;  %v3723_v40 = vld [vmem:[#allocation2 + $0x20] sm:$0xff] }
 0x245   : > { %v2169_v42 = vpack.c.bf16 %v2146_v52, %v2145_v48  ;;  %v3379_v60 = vpop.f32.mrb[20].mxu1  ;;  %v3724_v52 = vld [vmem:[#allocation2 + $0x38] sm:$0xff] }
 0x246   : > { %v3499_v25 = vadd.f32 %v4665_v37, %v3379_v60  ;;  %v2050_v62 = vpop.f32.mrb[21].mxu1  ;;  %v3725_v60 = vld [vmem:[#allocation2 + $0x28] sm:$0xff] }
 0x247   : > { %v3502_v0 = vadd.f32 %v4659_v18, %v2050_v62  ;;  %v3380_v21 = vpop.f32.mrb[22].mxu1  ;;  %3421 = vmatprep.mubr.bf16.mxu0 %v2169_v42 }
 0x248   : > { %v3505_v38 = vadd.f32 %v4668_v26, %v3380_v21  ;;  %v2053_v44 = vpop.f32.mrb[23].mxu1  ;;  %3422 = vmatmul.mubr.bf16.gmra.mrb[144].mxu0 %v2170_v15  ;;  %v2151_v50 = vmax.f32 %v3499_v25, 0.0 }
 0x249   : > { %v3508_v9 = vadd.f32 %v4662_v55, %v2053_v44  ;;  %v2149_v63 = vmax.f32 %v3502_v0, 0.0  ;;  %v3726_v0 = vld [vmem:[#allocation2 + $0x50] sm:$0xff]  ;;  %v3727_v44 = vld [vmem:[#allocation2 + $0x40] sm:$0xff] }
 0x24a   : > { %v2152_v59 = vmax.f32 %v3505_v38, 0.0 }
 0x24b   : > { %v2150_v54 = vmax.f32 %v3508_v9, 0.0 }
 0x24c   : > { %v2172_v16 = vpack.c.bf16 %v2152_v59, %v2151_v50  ;;  %v3728_v59 = vld [vmem:[#allocation2 + $0x58] sm:$0xff] }
 0x24d   : > { %v2171_v39 = vpack.c.bf16 %v2150_v54, %v2149_v63  ;;  %v3383_v30 = vpop.f32.mrb[24].mxu1 }
 0x24e   : > { %v3511_v37 = vadd.f32 %v4677_v32, %v3383_v30  ;;  %v2066_v29 = vpop.f32.mrb[25].mxu1 }
 0x24f   : > { %v3514_v18 = vadd.f32 %v4671_v11, %v2066_v29  ;;  %v3384_v1 = vpop.f32.mrb[26].mxu1  ;;  %3425 = vmatprep.mubr.bf16.mxu0 %v2171_v39 }
 0x250   : > { %v3517_v26 = vadd.f32 %v4680_v57, %v3384_v1  ;;  %v2069_v23 = vpop.f32.mrb[27].mxu1  ;;  %3426 = vmatmul.mubr.bf16.gmra.mrb[148].mxu0 %v2172_v16  ;;  %v2155_v56 = vmax.f32 %v3511_v37, 0.0  ;;  %v3729_v16 = vld [vmem:[#allocation2 + $0x48] sm:$0xff]  ;;  %v3730_v37 = vld [vmem:[#allocation2 + $0x70] sm:$0xff]  ;;  %v3731_v1 = vld [vmem:[#allocation2 + $0x60] sm:$0xff] }
 0x251   : > { %v3520_v55 = vadd.f32 %v4674_v3, %v2069_v23  ;;  %v2153_v17 = vmax.f32 %v3514_v18, 0.0 }
 0x252   : > { %v2156_v31 = vmax.f32 %v3517_v26, 0.0 }
 0x253   : > { %v2154_v7 = vmax.f32 %v3520_v55, 0.0  ;;  %v3732_v55 = vld [vmem:[#allocation2 + $0x78] sm:$0xff] }
 0x254   : > { %v2174_v24 = vpack.c.bf16 %v2156_v31, %v2155_v56 }
 0x255   : > { %v2173_v49 = vpack.c.bf16 %v2154_v7, %v2153_v17  ;;  %v3387_v51 = vpop.f32.mrb[28].mxu1  ;;  %v3733_v17 = vld [vmem:[#allocation2 + $0x68] sm:$0xff] }
 0x256   : > { %v3523_v32 = vadd.f32 %v4689_v19, %v3387_v51  ;;  %v2082_v5 = vpop.f32.mrb[29].mxu1 }
 0x257   : > { %v3526_v11 = vadd.f32 %v4683_v47, %v2082_v5  ;;  %v3388_v58 = vpop.f32.mrb[30].mxu1  ;;  %3429 = vmatprep.mubr.bf16.mxu0 %v2173_v49  ;;  %v3734_v49 = vld [vmem:[#allocation2 + $0x90] sm:$0xff]  ;;  %v3735_v5 = vld [vmem:[#allocation2 + $0x80] sm:$0xff] }
 0x258   : > { %v3529_v57 = vadd.f32 %v4692_v8, %v3388_v58  ;;  %v2085_v33 = vpop.f32.mrb[31].mxu1  ;;  %3430 = vmatmul.mubr.bf16.gmra.mrb[152].mxu0 %v2174_v24  ;;  %v2159_v14 = vmax.f32 %v3523_v32, 0.0 }
 0x259   : > { %v3532_v3 = vadd.f32 %v4686_v4, %v2085_v33  ;;  %v2157_v45 = vmax.f32 %v3526_v11, 0.0  ;;  %v3720_v4 = vld [vmem:[#allocation2 + $0x18] sm:$0xff] }
 0x25a   : > { %v2160_v20 = vmax.f32 %v3529_v57, 0.0  ;;  %v3736_v57 = vld [vmem:[#allocation2 + $0x98] sm:$0xff] }
 0x25b   : > { %v2158_v6 = vmax.f32 %v3532_v3, 0.0 }
 0x25c   : > { %v2176_v61 = vpack.c.bf16 %v2160_v20, %v2159_v14  ;;  %v3737_v14 = vld [vmem:[#allocation2 + $0x88] sm:$0xff] }
 0x25d   : > { %v2175_v36 = vpack.c.bf16 %v2158_v6, %v2157_v45  ;;  %v3738_v6 = vld [vmem:[#allocation2 + $0xb0] sm:$0xff] }
 0x25f   : > { %3433 = vmatprep.mubr.bf16.mxu0 %v2175_v36 }
 0x260   : > { %3434 = vmatmul.mubr.bf16.gmra.mrb[156].mxu0 %v2176_v61 }
 0x2fb   : > { %v3407_v19 = vpop.f32.mrb[128].mxu0 }
 0x2fc   : > { %v4726_v53 = vadd.f32 %v3718_v22, %v3407_v19  ;;  %v2278_v47 = vpop.f32.mrb[129].mxu0  ;;  %v3739_v19 = vld [vmem:[#allocation2 + $0xa0] sm:$0xff] }
 0x2fd   : > { %v4728_v27 = vadd.f32 %v3719_v12, %v2278_v47  ;;  %v3408_v8 = vpop.f32.mrb[130].mxu0  ;;  %v3740_v12 = vld [vmem:[#allocation2 + $0xb8] sm:$0xff] }
 0x2fe   : > { %2439 = vst [vmem:[#allocation2 + $0x10] sm:$0xff] %v4726_v53  ;;  %v4731_v2 = vadd.f32 %v3720_v4, %v3408_v8  ;;  %v2281_v43 = vpop.f32.mrb[131].mxu0 }
 0x2ff   : > { %2437 = vst [vmem:[#allocation2] sm:$0xff] %v4728_v27  ;;  %v4734_v34 = vadd.f32 %v3721_v28, %v2281_v43  ;;  %v3741_v43 = vld [vmem:[#allocation2 + $0xa8] sm:$0xff] }
 0x300   : > { %2440 = vst [vmem:[#allocation2 + $0x18] sm:$0xff] %v4731_v2 }
 0x301   : > { %2438 = vst [vmem:[#allocation2 + $0x8] sm:$0xff] %v4734_v34 }
 0x303   : > { %v3411_v41 = vpop.f32.mrb[132].mxu0 }
 0x304   : > { %v4738_v35 = vadd.f32 %v3722_v10, %v3411_v41  ;;  %v2294_v46 = vpop.f32.mrb[133].mxu0  ;;  %v3742_v10 = vld [vmem:[#allocation2 + $0xd0] sm:$0xff] }
 0x305   : > { %v4740_v13 = vadd.f32 %v3723_v40, %v2294_v46  ;;  %v3412_v48 = vpop.f32.mrb[134].mxu0 }
 0x306   : > { %2443 = vst [vmem:[#allocation2 + $0x30] sm:$0xff] %v4738_v35  ;;  %v4743_v15 = vadd.f32 %v3724_v52, %v3412_v48  ;;  %v2297_v42 = vpop.f32.mrb[135].mxu0  ;;  %v3743_v48 = vld [vmem:[#allocation2 + $0xc0] sm:$0xff] }
 0x307   : > { %2441 = vst [vmem:[#allocation2 + $0x20] sm:$0xff] %v4740_v13  ;;  %v4746_v25 = vadd.f32 %v3725_v60, %v2297_v42  ;;  %v3744_v60 = vld [vmem:[#allocation2 + $0xd8] sm:$0xff] }
 0x308   : > { %2444 = vst [vmem:[#allocation2 + $0x38] sm:$0xff] %v4743_v15 }
 0x309   : > { %2442 = vst [vmem:[#allocation2 + $0x28] sm:$0xff] %v4746_v25 }
 0x30b   : > { %v3415_v62 = vpop.f32.mrb[136].mxu0 }
 0x30c   : > { %v4750_v21 = vadd.f32 %v3726_v0, %v3415_v62  ;;  %v2310_v38 = vpop.f32.mrb[137].mxu0 }
 0x30d   : > { %v4752_v9 = vadd.f32 %v3727_v44, %v2310_v38  ;;  %v3416_v50 = vpop.f32.mrb[138].mxu0  ;;  %v3745_v38 = vld [vmem:[#allocation2 + $0xc8] sm:$0xff] }
 0x30e   : > { %2447 = vst [vmem:[#allocation2 + $0x50] sm:$0xff] %v4750_v21  ;;  %v4755_v63 = vadd.f32 %v3728_v59, %v3416_v50  ;;  %v2313_v54 = vpop.f32.mrb[139].mxu0  ;;  %v3746_v59 = vld [vmem:[#allocation2 + $0xf0] sm:$0xff] }
 0x30f   : > { %2445 = vst [vmem:[#allocation2 + $0x40] sm:$0xff] %v4752_v9  ;;  %v4758_v39 = vadd.f32 %v3729_v16, %v2313_v54 }
 0x310   : > { %2448 = vst [vmem:[#allocation2 + $0x58] sm:$0xff] %v4755_v63 }
 0x311   : > { %2446 = vst [vmem:[#allocation2 + $0x48] sm:$0xff] %v4758_v39 }
 0x313   : > { %v3419_v30 = vpop.f32.mrb[140].mxu0 }
 0x314   : > { %v4762_v29 = vadd.f32 %v3730_v37, %v3419_v30  ;;  %v2326_v18 = vpop.f32.mrb[141].mxu0  ;;  %v3747_v30 = vld [vmem:[#allocation2 + $0xe0] sm:$0xff] }
 0x315   : > { %v4764_v26 = vadd.f32 %v3731_v1, %v2326_v18  ;;  %v3420_v23 = vpop.f32.mrb[142].mxu0  ;;  %v3748_v1 = vld [vmem:[#allocation2 + $0xf8] sm:$0xff] }
 0x316   : > { %2451 = vst [vmem:[#allocation2 + $0x70] sm:$0xff] %v4762_v29  ;;  %v4767_v56 = vadd.f32 %v3732_v55, %v3420_v23  ;;  %v2329_v31 = vpop.f32.mrb[143].mxu0 }
 0x317   : > { %2449 = vst [vmem:[#allocation2 + $0x60] sm:$0xff] %v4764_v26  ;;  %v4770_v7 = vadd.f32 %v3733_v17, %v2329_v31  ;;  %v3749_v31 = vld [vmem:[#allocation2 + $0xe8] sm:$0xff] }
 0x318   : > { %2452 = vst [vmem:[#allocation2 + $0x78] sm:$0xff] %v4767_v56 }
 0x319   : > { %2450 = vst [vmem:[#allocation2 + $0x68] sm:$0xff] %v4770_v7 }
 0x31b   : > { %v3423_v24 = vpop.f32.mrb[144].mxu0 }
 0x31c   : > { %v4774_v51 = vadd.f32 %v3734_v49, %v3423_v24  ;;  %v2342_v32 = vpop.f32.mrb[145].mxu0  ;;  %v2473_v24 = vmax.f32 (!%p2806_p7), %v4728_v27, 0.0  ;;  %v2474_v49 = vmax.f32 (!%p2806_p7), %v4734_v34, 0.0  ;;  %v2482_v27 = vmax.f32 (!%p2806_p7), %v4758_v39, 0.0 }
 0x31d   : > { %v4776_v11 = vadd.f32 %v3735_v5, %v2342_v32  ;;  %v3424_v58 = vpop.f32.mrb[146].mxu0  ;;  %v2475_v32 = vmax.f32 (!%p2806_p7), %v4726_v53, 0.0  ;;  %v2476_v5 = vmax.f32 (!%p2806_p7), %v4731_v2, 0.0  ;;  %v2481_v53 = vmax.f32 (!%p2806_p7), %v4752_v9, 0.0 }
 0x31e   : > { %2455 = vst [vmem:[#allocation2 + $0x90] sm:$0xff] %v4774_v51  ;;  %v4779_v33 = vadd.f32 %v3736_v57, %v3424_v58  ;;  %v2345_v3 = vpop.f32.mrb[147].mxu0  ;;  %v2477_v58 = vmax.f32 (!%p2806_p7), %v4740_v13, 0.0  ;;  %v2478_v57 = vmax.f32 (!%p2806_p7), %v4746_v25, 0.0  ;;  %2505 = vst [vmem:[%s3851_s25] sm:$0xff] (!%p2806_p7), %v2473_v24  ;;  %v2483_v2 = vmax.f32 (!%p2806_p7), %v4750_v21, 0.0 }
 0x31f   : > { %2453 = vst [vmem:[#allocation2 + $0x80] sm:$0xff] %v4776_v11  ;;  %v4782_v20 = vadd.f32 %v3737_v14, %v2345_v3  ;;  %v2479_v3 = vmax.f32 (!%p2806_p7), %v4738_v35, 0.0  ;;  %v2480_v14 = vmax.f32 (!%p2806_p7), %v4743_v15, 0.0  ;;  %2506 = vst [vmem:[%s3851_s25 + $0x8] sm:$0xff] (!%p2806_p7), %v2474_v49  ;;  %v2484_v34 = vmax.f32 (!%p2806_p7), %v4755_v63, 0.0 }
 0x320   : > { %2456 = vst [vmem:[#allocation2 + $0x98] sm:$0xff] %v4779_v33  ;;  %2507 = vst [vmem:[%s3851_s25 + $0x10] sm:$0xff] (!%p2806_p7), %v2475_v32  ;;  %v2485_v35 = vmax.f32 (!%p2806_p7), %v4764_v26, 0.0  ;;  %v2486_v13 = vmax.f32 (!%p2806_p7), %v4770_v7, 0.0  ;;  %v2487_v15 = vmax.f32 (!%p2806_p7), %v4762_v29, 0.0  ;;  %v2488_v25 = vmax.f32 (!%p2806_p7), %v4767_v56, 0.0 }
 0x321   : > { %2454 = vst [vmem:[#allocation2 + $0x88] sm:$0xff] %v4782_v20  ;;  %2508 = vst [vmem:[%s3851_s25 + $0x18] sm:$0xff] (!%p2806_p7), %v2476_v5  ;;  %v2489_v21 = vmax.f32 (!%p2806_p7), %v4776_v11, 0.0  ;;  %v2490_v9 = vmax.f32 (!%p2806_p7), %v4782_v20, 0.0  ;;  %v2491_v63 = vmax.f32 (!%p2806_p7), %v4774_v51, 0.0  ;;  %v2492_v39 = vmax.f32 (!%p2806_p7), %v4779_v33, 0.0 }
 0x322   : > { %2509 = vst [vmem:[%s3851_s25 + $0x20] sm:$0xff] (!%p2806_p7), %v2477_v58  ;;  %2510 = vst [vmem:[%s3851_s25 + $0x28] sm:$0xff] (!%p2806_p7), %v2478_v57 }
 0x323   : > { %v3427_v45 = vpop.f32.mrb[148].mxu0  ;;  %2511 = vst [vmem:[%s3851_s25 + $0x30] sm:$0xff] (!%p2806_p7), %v2479_v3  ;;  %2512 = vst [vmem:[%s3851_s25 + $0x38] sm:$0xff] (!%p2806_p7), %v2480_v14 }
 0x324   : > { %v4786_v61 = vadd.f32 %v3738_v6, %v3427_v45  ;;  %v2358_v36 = vpop.f32.mrb[149].mxu0  ;;  %2513 = vst [vmem:[%s3851_s25 + $0x40] sm:$0xff] (!%p2806_p7), %v2481_v53  ;;  %2514 = vst [vmem:[%s3851_s25 + $0x48] sm:$0xff] (!%p2806_p7), %v2482_v27 }
 0x325   : > { %v4788_v22 = vadd.f32 %v3739_v19, %v2358_v36  ;;  %v3428_v47 = vpop.f32.mrb[150].mxu0  ;;  %2515 = vst [vmem:[%s3851_s25 + $0x50] sm:$0xff] (!%p2806_p7), %v2483_v2  ;;  %2516 = vst [vmem:[%s3851_s25 + $0x58] sm:$0xff] (!%p2806_p7), %v2484_v34 }
 0x326   : > { %2459 = vst [vmem:[#allocation2 + $0xb0] sm:$0xff] %v4786_v61  ;;  %v4791_v8 = vadd.f32 %v3740_v12, %v3428_v47  ;;  %v2361_v4 = vpop.f32.mrb[151].mxu0  ;;  %2517 = vst [vmem:[%s3851_s25 + $0x60] sm:$0xff] (!%p2806_p7), %v2485_v35  ;;  %v2495_v56 = vmax.f32 (!%p2806_p7), %v4786_v61, 0.0 }
 0x327   : > { %2457 = vst [vmem:[#allocation2 + $0xa0] sm:$0xff] %v4788_v22  ;;  %v4794_v28 = vadd.f32 %v3741_v43, %v2361_v4  ;;  %2518 = vst [vmem:[%s3851_s25 + $0x68] sm:$0xff] (!%p2806_p7), %v2486_v13  ;;  %v2493_v29 = vmax.f32 (!%p2806_p7), %v4788_v22, 0.0 }
 0x328   : > { %2460 = vst [vmem:[#allocation2 + $0xb8] sm:$0xff] %v4791_v8  ;;  %2519 = vst [vmem:[%s3851_s25 + $0x70] sm:$0xff] (!%p2806_p7), %v2487_v15  ;;  %v2496_v7 = vmax.f32 (!%p2806_p7), %v4791_v8, 0.0 }
 0x329   : > { %2458 = vst [vmem:[#allocation2 + $0xa8] sm:$0xff] %v4794_v28  ;;  %2520 = vst [vmem:[%s3851_s25 + $0x78] sm:$0xff] (!%p2806_p7), %v2488_v25  ;;  %v2494_v26 = vmax.f32 (!%p2806_p7), %v4794_v28, 0.0 }
 0x32a   : > { %2521 = vst [vmem:[%s3851_s25 + $0x80] sm:$0xff] (!%p2806_p7), %v2489_v21  ;;  %2522 = vst [vmem:[%s3851_s25 + $0x88] sm:$0xff] (!%p2806_p7), %v2490_v9 }
 0x32b   : > { %v3431_v41 = vpop.f32.mrb[152].mxu0  ;;  %2523 = vst [vmem:[%s3851_s25 + $0x90] sm:$0xff] (!%p2806_p7), %v2491_v63  ;;  %2524 = vst [vmem:[%s3851_s25 + $0x98] sm:$0xff] (!%p2806_p7), %v2492_v39 }
 0x32c   : > { %v4798_v46 = vadd.f32 %v3742_v10, %v3431_v41  ;;  %v2374_v40 = vpop.f32.mrb[153].mxu0  ;;  %2525 = vst [vmem:[%s3851_s25 + $0xa0] sm:$0xff] (!%p2806_p7), %v2493_v29  ;;  %2526 = vst [vmem:[%s3851_s25 + $0xa8] sm:$0xff] (!%p2806_p7), %v2494_v26 }
 0x32d   : > { %v4800_v52 = vadd.f32 %v3743_v48, %v2374_v40  ;;  %v3432_v42 = vpop.f32.mrb[154].mxu0  ;;  %2527 = vst [vmem:[%s3851_s25 + $0xb0] sm:$0xff] (!%p2806_p7), %v2495_v56  ;;  %2528 = vst [vmem:[%s3851_s25 + $0xb8] sm:$0xff] (!%p2806_p7), %v2496_v7 }
 0x32e   : > { %2463 = vst [vmem:[#allocation2 + $0xd0] sm:$0xff] %v4798_v46  ;;  %v4803_v62 = vadd.f32 %v3744_v60, %v3432_v42  ;;  %v2377_v0 = vpop.f32.mrb[155].mxu0  ;;  %v2499_v33 = vmax.f32 (!%p2806_p7), %v4798_v46, 0.0 }
 0x32f   : > { %2461 = vst [vmem:[#allocation2 + $0xc0] sm:$0xff] %v4800_v52  ;;  %v4806_v44 = vadd.f32 %v3745_v38, %v2377_v0  ;;  %v2497_v51 = vmax.f32 (!%p2806_p7), %v4800_v52, 0.0 }
 0x330   : > { %2464 = vst [vmem:[#allocation2 + $0xd8] sm:$0xff] %v4803_v62  ;;  %v2500_v20 = vmax.f32 (!%p2806_p7), %v4803_v62, 0.0  ;;  %2531 = vst [vmem:[%s3851_s25 + $0xd0] sm:$0xff] (!%p2806_p7), %v2499_v33 }
 0x331   : > { %2462 = vst [vmem:[#allocation2 + $0xc8] sm:$0xff] %v4806_v44  ;;  %v2498_v11 = vmax.f32 (!%p2806_p7), %v4806_v44, 0.0  ;;  %2529 = vst [vmem:[%s3851_s25 + $0xc0] sm:$0xff] (!%p2806_p7), %v2497_v51 }
 0x332   : > { %2532 = vst [vmem:[%s3851_s25 + $0xd8] sm:$0xff] (!%p2806_p7), %v2500_v20 }
 0x333   : > { %v3435_v50 = vpop.f32.mrb[156].mxu0  ;;  %2472 = sbr.rel (%p2806_p7) target bundleno = 828 (0x33c), region = 40  ;;  %2530 = vst [vmem:[%s3851_s25 + $0xc8] sm:$0xff] (!%p2806_p7), %v2498_v11 }
 0x334   : > { %v4810_v54 = vadd.f32 %v3746_v59, %v3435_v50  ;;  %v2390_v16 = vpop.f32.mrb[157].mxu0 }
 0x335   : > { %v4812_v37 = vadd.f32 %v3747_v30, %v2390_v16  ;;  %v3436_v18 = vpop.f32.mrb[158].mxu0 }
 0x336   : > { %2467 = vst [vmem:[#allocation2 + $0xf0] sm:$0xff] %v4810_v54  ;;  %v4815_v23 = vadd.f32 %v3748_v1, %v3436_v18  ;;  %v2393_v55 = vpop.f32.mrb[159].mxu0  ;;  %v2503_v61 = vmax.f32 (!%p2806_p7), %v4810_v54, 0.0 }
 0x337   : > { %2465 = vst [vmem:[#allocation2 + $0xe0] sm:$0xff] %v4812_v37  ;;  %v4818_v17 = vadd.f32 %v3749_v31, %v2393_v55  ;;  %v2501_v45 = vmax.f32 (!%p2806_p7), %v4812_v37, 0.0 }
 0x338   : > { %2468 = vst [vmem:[#allocation2 + $0xf8] sm:$0xff] %v4815_v23  ;;  %v2504_v36 = vmax.f32 (!%p2806_p7), %v4815_v23, 0.0  ;;  %2535 = vst [vmem:[%s3851_s25 + $0xf0] sm:$0xff] (!%p2806_p7), %v2503_v61 }
 0x339   : > { %2466 = vst [vmem:[#allocation2 + $0xe8] sm:$0xff] %v4818_v17  ;;  %v2502_v6 = vmax.f32 (!%p2806_p7), %v4818_v17, 0.0  ;;  %2533 = vst [vmem:[%s3851_s25 + $0xe0] sm:$0xff] (!%p2806_p7), %v2501_v45 }
 0x33a   : > { %2536 = vst [vmem:[%s3851_s25 + $0xf8] sm:$0xff] %v2504_v36 }
 0x33b   : > { %2534 = vst [vmem:[%s3851_s25 + $0xe8] sm:$0xff] %v2502_v6 }
 0x33c PF: > { %s13_s16 = sadd.s32 1, %s3788_s16   ;;  %s4920_s12 = smov %s3780_s14 }
 0x33d   : > { %p10_p8 = scmp.ge.s32.totalorder %s13_s16, 6   ;;  %s4921_s13 = smov %s3784_s15 }
 0x33e   : > { %s4922_s14 = smov %s4925_s17  ;;  %s4923_s15 = smov %s4929_s18 }
 0x33f   :  { %12 = sbr.rel (!%p10_p8) target bundleno = 3 (0x3), region = 74 }

</bundles_post_ra>
